<compile_context>
chip_gen: v7x
topology: tpu7x:2x2x1
jax: 0.10.0
libtpu: 0.0.40
codegen_flags: <defaults>
</compile_context>

<pallas_src>
import functools

import jax
import jax.numpy as jnp
from jax.experimental import pallas as pl
from jax.experimental.pallas import tpu as pltpu


# ----------------------------------------------------------------------------
# Fused Pallas kernel: one (image, output-row-tile) per grid step.
# ----------------------------------------------------------------------------
def _fused_inverted_residual_kernel(
        x_ref,      # (1, Hp_pad, Wp, Cin)  whole padded image (VMEM resident per n)
        w1_ref,     # (Cin, Cmid)           1x1 expand weight
        s1_ref, b1_ref,                     # (1, Cmid) folded BN1
        wdw_ref,    # (9, 1, Cmid)          3x3 depthwise weight, k = ky*3+kx
        s2_ref, b2_ref,                     # (1, Cmid) folded BN2
        w3_ref,     # (Cmid, Cout)          1x1 project weight
        s3_ref, b3_ref,                     # (1, Cout) folded BN3
        o_ref,      # (1, tile_ho, W_out, Cout)
        ex_ref,     # VMEM scratch (rows_in, Wp, Cmid): expanded row window
        *, stride, dilation, H, W, W_out, tile_ho, rows_in, use_res):
    d = dilation
    Wp = W + 2 * d
    Cmid = w1_ref.shape[1]

    t = pl.program_id(1)
    # first padded input row needed by this output row-tile
    row_start = t * (tile_ho * stride)

    # Column-validity mask for the padded halo: the expand of a zero-padded
    # pixel is relu(b1) != 0, so it must be zeroed before the depthwise taps.
    col_idx = jax.lax.broadcasted_iota(jnp.int32, (Wp, Cmid), 0)
    col_ok = jnp.logical_and(col_idx >= d, col_idx < d + W)

    w1 = w1_ref[...]
    s1 = s1_ref[...]
    b1 = b1_ref[...]

    # ---- stage 1: 1x1 expand + BN + ReLU, one padded row at a time -> VMEM.
    for h in range(rows_in):
        g = row_start + h                        # global padded row index
        x_row = x_ref[0, g, :, :]                # (Wp, Cin)
        e = jnp.dot(x_row, w1, preferred_element_type=jnp.float32)
        e = e * s1 + b1
        e = jnp.maximum(e, 0.0)
        e = jnp.where(col_ok, e, 0.0)
        row_ok = jnp.logical_and(g >= d, g < d + H).astype(jnp.float32)
        ex_ref[h] = e * row_ok                   # zero out padded halo rows

    # ---- stage 2: 3x3 depthwise (stride/dilation) + BN + ReLU, in registers.
    s2 = s2_ref[...]
    b2 = b2_ref[...]
    acc = jnp.zeros((tile_ho, W_out, Cmid), jnp.float32)
    for ky in range(3):
        for kx in range(3):
            if stride == 1:
                win = ex_ref[pl.ds(ky * d, tile_ho), pl.ds(kx * d, W_out), :]
            else:
                # strided window -> strided output is computed directly
                win = ex_ref[pl.ds(ky * d, tile_ho, stride=stride),
                             pl.ds(kx * d, W_out, stride=stride), :]
            acc = acc + win * wdw_ref[ky * 3 + kx]      # (1, Cmid) broadcast
    acc = jnp.maximum(acc * s2 + b2, 0.0)

    # ---- stage 3: 1x1 project + BN (+ fused residual), one output row at a time.
    w3 = w3_ref[...]
    s3 = s3_ref[...]
    b3 = b3_ref[...]
    for ho in range(tile_ho):
        r = jnp.dot(acc[ho], w3, preferred_element_type=jnp.float32)  # (W_out, Cout)
        r = r * s3 + b3
        if use_res:
            # residual read straight from the already-resident input image
            r = r + x_ref[0, row_start + ho + d, pl.ds(d, W), :]
        o_ref[0, ho] = r.astype(o_ref.dtype)


# ----------------------------------------------------------------------------
# Wrapper
# ----------------------------------------------------------------------------
def inverted_residual_forward(x_nchw, params, *, stride, dilation, tile_ho=8):
    """InvertedResidual forward. x_nchw: (N, Cin, H, W) float32 -> (N, Cout, H', W')."""
    N, Cin, H, W = x_nchw.shape
    Cmid = params["w1"].shape[1]
    Cout = params["w3"].shape[1]
    d = dilation
    use_res = (stride == 1) and (Cin == Cout)

    H_out = (H - 1) // stride + 1
    W_out = (W - 1) // stride + 1
    tile = max(1, min(tile_ho, H_out))
    num_h = pl.cdiv(H_out, tile)
    H_out_pad = num_h * tile
    rows_in = (tile - 1) * stride + 2 * d + 1
    Wp = W + 2 * d
    # enough padded rows so that the last tile's window never reads OOB
    Hp_pad = max(H + 2 * d, (H_out_pad - 1) * stride + 2 * d + 1)

    x = jnp.transpose(x_nchw, (0, 2, 3, 1)).astype(jnp.float32)       # NHWC
    xpad = jnp.pad(x, ((0, 0), (d, Hp_pad - H - d), (d, d), (0, 0)))  # small Cin tensor only

    w1 = params["w1"].astype(jnp.float32)                  # (Cin, Cmid)
    wdw = params["wdw"].reshape(9, 1, Cmid).astype(jnp.float32)
    w3 = params["w3"].astype(jnp.float32)                  # (Cmid, Cout)
    s1 = params["s1"].reshape(1, Cmid).astype(jnp.float32)
    b1 = params["b1"].reshape(1, Cmid).astype(jnp.float32)
    s2 = params["s2"].reshape(1, Cmid).astype(jnp.float32)
    b2 = params["b2"].reshape(1, Cmid).astype(jnp.float32)
    s3 = params["s3"].reshape(1, Cout).astype(jnp.float32)
    b3 = params["b3"].reshape(1, Cout).astype(jnp.float32)

    kernel = functools.partial(
        _fused_inverted_residual_kernel,
        stride=stride, dilation=d, H=H, W=W, W_out=W_out,
        tile_ho=tile, rows_in=rows_in, use_res=use_res)

    out = pl.pallas_call(
        kernel,
        out_shape=jax.ShapeDtypeStruct((N, H_out_pad, W_out, Cout), jnp.float32),
        grid=(N, num_h),
        in_specs=[
            pl.BlockSpec((1, Hp_pad, Wp, Cin), lambda n, t: (n, 0, 0, 0)),
            pl.BlockSpec((Cin, Cmid), lambda n, t: (0, 0)),
            pl.BlockSpec((1, Cmid), lambda n, t: (0, 0)),
            pl.BlockSpec((1, Cmid), lambda n, t: (0, 0)),
            pl.BlockSpec((9, 1, Cmid), lambda n, t: (0, 0, 0)),
            pl.BlockSpec((1, Cmid), lambda n, t: (0, 0)),
            pl.BlockSpec((1, Cmid), lambda n, t: (0, 0)),
            pl.BlockSpec((Cmid, Cout), lambda n, t: (0, 0)),
            pl.BlockSpec((1, Cout), lambda n, t: (0, 0)),
            pl.BlockSpec((1, Cout), lambda n, t: (0, 0)),
        ],
        out_specs=pl.BlockSpec((1, tile, W_out, Cout), lambda n, t: (n, t, 0, 0)),
        scratch_shapes=[pltpu.VMEM((rows_in, Wp, Cmid), jnp.float32)],
        compiler_params=pltpu.CompilerParams(
            dimension_semantics=("parallel", "parallel")),
    )(xpad, w1, s1, b1, wdw, s2, b2, w3, s3, b3)

    out = out[:, :H_out]                       # drop row-tile padding, if any
    return jnp.transpose(out, (0, 3, 1, 2))    # -> NCHW


# ----------------------------------------------------------------------------
# Parameter construction (folded eval-mode BN) and pure-JAX reference.
# ----------------------------------------------------------------------------
def make_params(key, inp, oup, expand_ratio):
    cmid = inp * expand_ratio
    ks = jax.random.split(key, 12)
    eps = 1e-5

    def bn_fold(kg, kb, km, kv, c):
        gamma = jax.random.uniform(kg, (c,), jnp.float32, 0.5, 1.5)
        beta = jax.random.normal(kb, (c,), jnp.float32) * 0.1
        mean = jax.random.normal(km, (c,), jnp.float32) * 0.1
        var = jax.random.uniform(kv, (c,), jnp.float32, 0.5, 1.5)
        scale = gamma / jnp.sqrt(var + eps)
        bias = beta - mean * scale
        return scale, bias

    w1 = jax.random.normal(ks[0], (inp, cmid), jnp.float32) * 0.1     # expand (K, N)
    wdw = jax.random.normal(ks[1], (3, 3, cmid), jnp.float32) * 0.1   # depthwise
    w3 = jax.random.normal(ks[2], (cmid, oup), jnp.float32) * 0.1     # project (K, N)
    s1, b1 = bn_fold(ks[3], ks[4], ks[5], ks[6], cmid)
    s2, b2 = bn_fold(ks[7], ks[8], ks[9], ks[10], cmid)
    k11, k12, k13, k14 = jax.random.split(ks[11], 4)
    s3, b3 = bn_fold(k11, k12, k13, k14, oup)
    return dict(w1=w1, s1=s1, b1=b1, wdw=wdw, s2=s2, b2=b2, w3=w3, s3=s3, b3=b3)


def reference_forward(x_nchw, params, *, stride, dilation):
    N, Cin, H, W = x_nchw.shape
    Cmid = params["w1"].shape[1]
    Cout = params["w3"].shape[1]
    use_res_connect = (stride == 1) and (Cin == Cout)
    x = jnp.transpose(x_nchw, (0, 2, 3, 1))
    dn = ("NHWC", "HWIO", "NHWC")
    hp = jax.lax.Precision.HIGHEST

    h = jax.lax.conv_general_dilated(
        x, params["w1"].reshape(1, 1, Cin, Cmid), (1, 1), "VALID",
        dimension_numbers=dn, precision=hp)
    h = jnp.maximum(h * params["s1"] + params["b1"], 0.0)

    h = jax.lax.conv_general_dilated(
        h, params["wdw"].reshape(3, 3, 1, Cmid), (stride, stride),
        ((dilation, dilation), (dilation, dilation)),
        rhs_dilation=(dilation, dilation), feature_group_count=Cmid,
        dimension_numbers=dn, precision=hp)
    h = jnp.maximum(h * params["s2"] + params["b2"], 0.0)

    h = jax.lax.conv_general_dilated(
        h, params["w3"].reshape(1, 1, Cmid, Cout), (1, 1), "VALID",
        dimension_numbers=dn, precision=hp)
    h = h * params["s3"] + params["b3"]
    if use_res_connect:
        h = h + x
    return jnp.transpose(h, (0, 3, 1, 2))


# ----------------------------------------------------------------------------
if __name__ == "__main__":
    key = jax.random.PRNGKey(0)
    N, H, W = 2, 16, 16
    configs = [
        # (inp, oup, stride, expand_ratio, dilation, tile_ho)
        (16, 16, 1, 2, 1, 4),   # residual path, multiple row tiles
        (16, 24, 2, 4, 1, 4),   # strided output computed directly in-kernel
        (16, 16, 1, 2, 2, 8),   # dilated depthwise
    ]
    for idx, (inp, oup, stride, er, dil, tile_ho) in enumerate(configs):
        key, kx, kp = jax.random.split(key, 3)
        x = jax.random.normal(kx, (N, inp, H, W), jnp.float32)  # NCHW, PyTorch-style
        params = make_params(kp, inp, oup, er)

        out = jax.block_until_ready(
            inverted_residual_forward(x, params, stride=stride, dilation=dil,
                                      tile_ho=tile_ho))
        ref = jax.block_until_ready(
            reference_forward(x, params, stride=stride, dilation=dil))

        assert out.shape == ref.shape, (idx, out.shape, ref.shape)
        max_err = float(jnp.max(jnp.abs(out - ref)))
        assert jnp.allclose(out, ref, rtol=2e-2, atol=2e-2), (idx, max_err)

    print("KERNEL_OK")
</pallas_src>

<mosaic_0001>
module attributes {stable_mosaic.version = 11 : i64} {
  func.func @_fused_inverted_residual_kernel(%arg0: i32, %arg1: i32, %arg2: memref<1x18x18x16xf32, #tpu.memory_space<vmem>>, %arg3: memref<16x32xf32, #tpu.memory_space<vmem>>, %arg4: memref<1x32xf32, #tpu.memory_space<vmem>>, %arg5: memref<1x32xf32, #tpu.memory_space<vmem>>, %arg6: memref<9x1x32xf32, #tpu.memory_space<vmem>>, %arg7: memref<1x32xf32, #tpu.memory_space<vmem>>, %arg8: memref<1x32xf32, #tpu.memory_space<vmem>>, %arg9: memref<32x16xf32, #tpu.memory_space<vmem>>, %arg10: memref<1x16xf32, #tpu.memory_space<vmem>>, %arg11: memref<1x16xf32, #tpu.memory_space<vmem>>, %arg12: memref<1x4x16x16xf32, #tpu.memory_space<vmem>>, %arg13: memref<6x18x32xf32, #tpu.memory_space<vmem>>) attributes {dimension_semantics = [#tpu.dimension_semantics<parallel>, #tpu.dimension_semantics<parallel>], iteration_bounds = array<i64: 2, 4>, scalar_prefetch = 0 : i64, scratch_operands = 1 : i64, tpu.core_type = #tpu.core_type<tc>, window_params = [{transform_indices = @transform_0, window_bounds = array<i64: 1, 18, 18, 16>}, {pipeline_mode = #tpu.pipeline_mode<synchronous>, transform_indices = @transform_1, window_bounds = array<i64: 16, 32>}, {pipeline_mode = #tpu.pipeline_mode<synchronous>, transform_indices = @transform_2, window_bounds = array<i64: 1, 32>}, {pipeline_mode = #tpu.pipeline_mode<synchronous>, transform_indices = @transform_3, window_bounds = array<i64: 1, 32>}, {pipeline_mode = #tpu.pipeline_mode<synchronous>, transform_indices = @transform_4, window_bounds = array<i64: 9, 1, 32>}, {pipeline_mode = #tpu.pipeline_mode<synchronous>, transform_indices = @transform_5, window_bounds = array<i64: 1, 32>}, {pipeline_mode = #tpu.pipeline_mode<synchronous>, transform_indices = @transform_6, window_bounds = array<i64: 1, 32>}, {pipeline_mode = #tpu.pipeline_mode<synchronous>, transform_indices = @transform_7, window_bounds = array<i64: 32, 16>}, {pipeline_mode = #tpu.pipeline_mode<synchronous>, transform_indices = @transform_8, window_bounds = array<i64: 1, 16>}, {pipeline_mode = #tpu.pipeline_mode<synchronous>, transform_indices = @transform_9, window_bounds = array<i64: 1, 16>}, {transform_indices = @transform_10, window_bounds = array<i64: 1, 4, 16, 16>}]} {
    %c4_i32 = arith.constant 4 : i32
    %0 = arith.muli %arg1, %c4_i32 : i32
    %1 = tpu.iota {dimensions = array<i32: 0>} : vector<18x32xi32>
    %c1_i32 = arith.constant 1 : i32
    %2 = vector.broadcast %c1_i32 : i32 to vector<18x32xi32>
    %3 = arith.cmpi sge, %1, %2 : vector<18x32xi32>
    %c17_i32 = arith.constant 17 : i32
    %4 = vector.broadcast %c17_i32 : i32 to vector<18x32xi32>
    %5 = arith.cmpi slt, %1, %4 : vector<18x32xi32>
    %6 = arith.andi %3, %5 : vector<18x32xi1>
    %c0 = arith.constant 0 : index
    %c0_0 = arith.constant 0 : index
    %7 = vector.load %arg3[%c0, %c0_0] : memref<16x32xf32, #tpu.memory_space<vmem>>, vector<16x32xf32>
    %c0_1 = arith.constant 0 : index
    %c0_2 = arith.constant 0 : index
    %8 = vector.load %arg4[%c0_1, %c0_2] : memref<1x32xf32, #tpu.memory_space<vmem>>, vector<1x32xf32>
    %c0_3 = arith.constant 0 : index
    %c0_4 = arith.constant 0 : index
    %9 = vector.load %arg5[%c0_3, %c0_4] : memref<1x32xf32, #tpu.memory_space<vmem>>, vector<1x32xf32>
    %c0_i32 = arith.constant 0 : i32
    %10 = arith.addi %0, %c0_i32 : i32
    %c0_5 = arith.constant 0 : index
    %11 = arith.index_cast %10 : i32 to index
    %c0_6 = arith.constant 0 : index
    %c0_7 = arith.constant 0 : index
    %12 = vector.load %arg2[%c0_5, %11, %c0_6, %c0_7] : memref<1x18x18x16xf32, #tpu.memory_space<vmem>>, vector<1x1x18x16xf32>
    %13 = vector.shape_cast %12 : vector<1x1x18x16xf32> to vector<18x16xf32>
    %cst = arith.constant dense<0.000000e+00> : vector<18x32xf32>
    %14 = tpu.matmul %13, %7, %cst {dimension_numbers = #tpu.dot_dimension_numbers<[1], [0], [0], [1], [0, 0, 1, 1], [], []>} : vector<18x16xf32>, vector<16x32xf32>, vector<18x32xf32> -> vector<18x32xf32>
    %15 = vector.broadcast %8 : vector<1x32xf32> to vector<18x32xf32>
    %16 = arith.mulf %14, %15 : vector<18x32xf32>
    %17 = vector.broadcast %9 : vector<1x32xf32> to vector<18x32xf32>
    %18 = arith.addf %16, %17 : vector<18x32xf32>
    %cst_8 = arith.constant 0.000000e+00 : f32
    %19 = vector.broadcast %cst_8 : f32 to vector<18x32xf32>
    %20 = arith.maximumf %18, %19 : vector<18x32xf32>
    %cst_9 = arith.constant 0.000000e+00 : f32
    %21 = vector.broadcast %cst_9 : f32 to vector<18x32xf32>
    %22 = arith.select %6, %20, %21 : vector<18x32xi1>, vector<18x32xf32>
    %c1_i32_10 = arith.constant 1 : i32
    %23 = arith.cmpi sge, %10, %c1_i32_10 : i32
    %c17_i32_11 = arith.constant 17 : i32
    %24 = arith.cmpi slt, %10, %c17_i32_11 : i32
    %25 = arith.andi %23, %24 : i1
    %26 = arith.extui %25 : i1 to i32
    %27 = arith.sitofp %26 : i32 to f32
    %28 = vector.broadcast %27 : f32 to vector<18x32xf32>
    %29 = arith.mulf %22, %28 : vector<18x32xf32>
    %c0_12 = arith.constant 0 : index
    %c0_13 = arith.constant 0 : index
    %c0_14 = arith.constant 0 : index
    %30 = vector.load %arg13[%c0_12, %c0_13, %c0_14] : memref<6x18x32xf32, #tpu.memory_space<vmem>>, vector<1x18x32xf32>
    %31 = vector.shape_cast %30 : vector<1x18x32xf32> to vector<18x32xf32>
    %32 = vector.shape_cast %29 : vector<18x32xf32> to vector<1x18x32xf32>
    tpu.vector_store %arg13[%c0_12, %c0_13, %c0_14], %32 {strides = array<i32>} : memref<6x18x32xf32, #tpu.memory_space<vmem>>, vector<1x18x32xf32>,
    %c1_i32_15 = arith.constant 1 : i32
    %33 = arith.addi %0, %c1_i32_15 : i32
    %c0_16 = arith.constant 0 : index
    %34 = arith.index_cast %33 : i32 to index
    %c0_17 = arith.constant 0 : index
    %c0_18 = arith.constant 0 : index
    %35 = vector.load %arg2[%c0_16, %34, %c0_17, %c0_18] : memref<1x18x18x16xf32, #tpu.memory_space<vmem>>, vector<1x1x18x16xf32>
    %36 = vector.shape_cast %35 : vector<1x1x18x16xf32> to vector<18x16xf32>
    %cst_19 = arith.constant dense<0.000000e+00> : vector<18x32xf32>
    %37 = tpu.matmul %36, %7, %cst_19 {dimension_numbers = #tpu.dot_dimension_numbers<[1], [0], [0], [1], [0, 0, 1, 1], [], []>} : vector<18x16xf32>, vector<16x32xf32>, vector<18x32xf32> -> vector<18x32xf32>
    %38 = vector.broadcast %8 : vector<1x32xf32> to vector<18x32xf32>
    %39 = arith.mulf %37, %38 : vector<18x32xf32>
    %40 = vector.broadcast %9 : vector<1x32xf32> to vector<18x32xf32>
    %41 = arith.addf %39, %40 : vector<18x32xf32>
    %cst_20 = arith.constant 0.000000e+00 : f32
    %42 = vector.broadcast %cst_20 : f32 to vector<18x32xf32>
    %43 = arith.maximumf %41, %42 : vector<18x32xf32>
    %cst_21 = arith.constant 0.000000e+00 : f32
    %44 = vector.broadcast %cst_21 : f32 to vector<18x32xf32>
    %45 = arith.select %6, %43, %44 : vector<18x32xi1>, vector<18x32xf32>
    %c1_i32_22 = arith.constant 1 : i32
    %46 = arith.cmpi sge, %33, %c1_i32_22 : i32
    %c17_i32_23 = arith.constant 17 : i32
    %47 = arith.cmpi slt, %33, %c17_i32_23 : i32
    %48 = arith.andi %46, %47 : i1
    %49 = arith.extui %48 : i1 to i32
    %50 = arith.sitofp %49 : i32 to f32
    %51 = vector.broadcast %50 : f32 to vector<18x32xf32>
    %52 = arith.mulf %45, %51 : vector<18x32xf32>
    %c1 = arith.constant 1 : index
    %c0_24 = arith.constant 0 : index
    %c0_25 = arith.constant 0 : index
    %53 = vector.load %arg13[%c1, %c0_24, %c0_25] : memref<6x18x32xf32, #tpu.memory_space<vmem>>, vector<1x18x32xf32>
    %54 = vector.shape_cast %53 : vector<1x18x32xf32> to vector<18x32xf32>
    %55 = vector.shape_cast %52 : vector<18x32xf32> to vector<1x18x32xf32>
    tpu.vector_store %arg13[%c1, %c0_24, %c0_25], %55 {strides = array<i32>} : memref<6x18x32xf32, #tpu.memory_space<vmem>>, vector<1x18x32xf32>,
    %c2_i32 = arith.constant 2 : i32
    %56 = arith.addi %0, %c2_i32 : i32
    %c0_26 = arith.constant 0 : index
    %57 = arith.index_cast %56 : i32 to index
    %c0_27 = arith.constant 0 : index
    %c0_28 = arith.constant 0 : index
    %58 = vector.load %arg2[%c0_26, %57, %c0_27, %c0_28] : memref<1x18x18x16xf32, #tpu.memory_space<vmem>>, vector<1x1x18x16xf32>
    %59 = vector.shape_cast %58 : vector<1x1x18x16xf32> to vector<18x16xf32>
    %cst_29 = arith.constant dense<0.000000e+00> : vector<18x32xf32>
    %60 = tpu.matmul %59, %7, %cst_29 {dimension_numbers = #tpu.dot_dimension_numbers<[1], [0], [0], [1], [0, 0, 1, 1], [], []>} : vector<18x16xf32>, vector<16x32xf32>, vector<18x32xf32> -> vector<18x32xf32>
    %61 = vector.broadcast %8 : vector<1x32xf32> to vector<18x32xf32>
    %62 = arith.mulf %60, %61 : vector<18x32xf32>
    %63 = vector.broadcast %9 : vector<1x32xf32> to vector<18x32xf32>
    %64 = arith.addf %62, %63 : vector<18x32xf32>
    %cst_30 = arith.constant 0.000000e+00 : f32
    %65 = vector.broadcast %cst_30 : f32 to vector<18x32xf32>
    %66 = arith.maximumf %64, %65 : vector<18x32xf32>
    %cst_31 = arith.constant 0.000000e+00 : f32
    %67 = vector.broadcast %cst_31 : f32 to vector<18x32xf32>
    %68 = arith.select %6, %66, %67 : vector<18x32xi1>, vector<18x32xf32>
    %c1_i32_32 = arith.constant 1 : i32
    %69 = arith.cmpi sge, %56, %c1_i32_32 : i32
    %c17_i32_33 = arith.constant 17 : i32
    %70 = arith.cmpi slt, %56, %c17_i32_33 : i32
    %71 = arith.andi %69, %70 : i1
    %72 = arith.extui %71 : i1 to i32
    %73 = arith.sitofp %72 : i32 to f32
    %74 = vector.broadcast %73 : f32 to vector<18x32xf32>
    %75 = arith.mulf %68, %74 : vector<18x32xf32>
    %c2 = arith.constant 2 : index
    %c0_34 = arith.constant 0 : index
    %c0_35 = arith.constant 0 : index
    %76 = vector.load %arg13[%c2, %c0_34, %c0_35] : memref<6x18x32xf32, #tpu.memory_space<vmem>>, vector<1x18x32xf32>
    %77 = vector.shape_cast %76 : vector<1x18x32xf32> to vector<18x32xf32>
    %78 = vector.shape_cast %75 : vector<18x32xf32> to vector<1x18x32xf32>
    tpu.vector_store %arg13[%c2, %c0_34, %c0_35], %78 {strides = array<i32>} : memref<6x18x32xf32, #tpu.memory_space<vmem>>, vector<1x18x32xf32>,
    %c3_i32 = arith.constant 3 : i32
    %79 = arith.addi %0, %c3_i32 : i32
    %c0_36 = arith.constant 0 : index
    %80 = arith.index_cast %79 : i32 to index
    %c0_37 = arith.constant 0 : index
    %c0_38 = arith.constant 0 : index
    %81 = vector.load %arg2[%c0_36, %80, %c0_37, %c0_38] : memref<1x18x18x16xf32, #tpu.memory_space<vmem>>, vector<1x1x18x16xf32>
    %82 = vector.shape_cast %81 : vector<1x1x18x16xf32> to vector<18x16xf32>
    %cst_39 = arith.constant dense<0.000000e+00> : vector<18x32xf32>
    %83 = tpu.matmul %82, %7, %cst_39 {dimension_numbers = #tpu.dot_dimension_numbers<[1], [0], [0], [1], [0, 0, 1, 1], [], []>} : vector<18x16xf32>, vector<16x32xf32>, vector<18x32xf32> -> vector<18x32xf32>
    %84 = vector.broadcast %8 : vector<1x32xf32> to vector<18x32xf32>
    %85 = arith.mulf %83, %84 : vector<18x32xf32>
    %86 = vector.broadcast %9 : vector<1x32xf32> to vector<18x32xf32>
    %87 = arith.addf %85, %86 : vector<18x32xf32>
    %cst_40 = arith.constant 0.000000e+00 : f32
    %88 = vector.broadcast %cst_40 : f32 to vector<18x32xf32>
    %89 = arith.maximumf %87, %88 : vector<18x32xf32>
    %cst_41 = arith.constant 0.000000e+00 : f32
    %90 = vector.broadcast %cst_41 : f32 to vector<18x32xf32>
    %91 = arith.select %6, %89, %90 : vector<18x32xi1>, vector<18x32xf32>
    %c1_i32_42 = arith.constant 1 : i32
    %92 = arith.cmpi sge, %79, %c1_i32_42 : i32
    %c17_i32_43 = arith.constant 17 : i32
    %93 = arith.cmpi slt, %79, %c17_i32_43 : i32
    %94 = arith.andi %92, %93 : i1
    %95 = arith.extui %94 : i1 to i32
    %96 = arith.sitofp %95 : i32 to f32
    %97 = vector.broadcast %96 : f32 to vector<18x32xf32>
    %98 = arith.mulf %91, %97 : vector<18x32xf32>
    %c3 = arith.constant 3 : index
    %c0_44 = arith.constant 0 : index
    %c0_45 = arith.constant 0 : index
    %99 = vector.load %arg13[%c3, %c0_44, %c0_45] : memref<6x18x32xf32, #tpu.memory_space<vmem>>, vector<1x18x32xf32>
    %100 = vector.shape_cast %99 : vector<1x18x32xf32> to vector<18x32xf32>
    %101 = vector.shape_cast %98 : vector<18x32xf32> to vector<1x18x32xf32>
    tpu.vector_store %arg13[%c3, %c0_44, %c0_45], %101 {strides = array<i32>} : memref<6x18x32xf32, #tpu.memory_space<vmem>>, vector<1x18x32xf32>,
    %c4_i32_46 = arith.constant 4 : i32
    %102 = arith.addi %0, %c4_i32_46 : i32
    %c0_47 = arith.constant 0 : index
    %103 = arith.index_cast %102 : i32 to index
    %c0_48 = arith.constant 0 : index
    %c0_49 = arith.constant 0 : index
    %104 = vector.load %arg2[%c0_47, %103, %c0_48, %c0_49] : memref<1x18x18x16xf32, #tpu.memory_space<vmem>>, vector<1x1x18x16xf32>
    %105 = vector.shape_cast %104 : vector<1x1x18x16xf32> to vector<18x16xf32>
    %cst_50 = arith.constant dense<0.000000e+00> : vector<18x32xf32>
    %106 = tpu.matmul %105, %7, %cst_50 {dimension_numbers = #tpu.dot_dimension_numbers<[1], [0], [0], [1], [0, 0, 1, 1], [], []>} : vector<18x16xf32>, vector<16x32xf32>, vector<18x32xf32> -> vector<18x32xf32>
    %107 = vector.broadcast %8 : vector<1x32xf32> to vector<18x32xf32>
    %108 = arith.mulf %106, %107 : vector<18x32xf32>
    %109 = vector.broadcast %9 : vector<1x32xf32> to vector<18x32xf32>
    %110 = arith.addf %108, %109 : vector<18x32xf32>
    %cst_51 = arith.constant 0.000000e+00 : f32
    %111 = vector.broadcast %cst_51 : f32 to vector<18x32xf32>
    %112 = arith.maximumf %110, %111 : vector<18x32xf32>
    %cst_52 = arith.constant 0.000000e+00 : f32
    %113 = vector.broadcast %cst_52 : f32 to vector<18x32xf32>
    %114 = arith.select %6, %112, %113 : vector<18x32xi1>, vector<18x32xf32>
    %c1_i32_53 = arith.constant 1 : i32
    %115 = arith.cmpi sge, %102, %c1_i32_53 : i32
    %c17_i32_54 = arith.constant 17 : i32
    %116 = arith.cmpi slt, %102, %c17_i32_54 : i32
    %117 = arith.andi %115, %116 : i1
    %118 = arith.extui %117 : i1 to i32
    %119 = arith.sitofp %118 : i32 to f32
    %120 = vector.broadcast %119 : f32 to vector<18x32xf32>
    %121 = arith.mulf %114, %120 : vector<18x32xf32>
    %c4 = arith.constant 4 : index
    %c0_55 = arith.constant 0 : index
    %c0_56 = arith.constant 0 : index
    %122 = vector.load %arg13[%c4, %c0_55, %c0_56] : memref<6x18x32xf32, #tpu.memory_space<vmem>>, vector<1x18x32xf32>
    %123 = vector.shape_cast %122 : vector<1x18x32xf32> to vector<18x32xf32>
    %124 = vector.shape_cast %121 : vector<18x32xf32> to vector<1x18x32xf32>
    tpu.vector_store %arg13[%c4, %c0_55, %c0_56], %124 {strides = array<i32>} : memref<6x18x32xf32, #tpu.memory_space<vmem>>, vector<1x18x32xf32>,
    %c5_i32 = arith.constant 5 : i32
    %125 = arith.addi %0, %c5_i32 : i32
    %c0_57 = arith.constant 0 : index
    %126 = arith.index_cast %125 : i32 to index
    %c0_58 = arith.constant 0 : index
    %c0_59 = arith.constant 0 : index
    %127 = vector.load %arg2[%c0_57, %126, %c0_58, %c0_59] : memref<1x18x18x16xf32, #tpu.memory_space<vmem>>, vector<1x1x18x16xf32>
    %128 = vector.shape_cast %127 : vector<1x1x18x16xf32> to vector<18x16xf32>
    %cst_60 = arith.constant dense<0.000000e+00> : vector<18x32xf32>
    %129 = tpu.matmul %128, %7, %cst_60 {dimension_numbers = #tpu.dot_dimension_numbers<[1], [0], [0], [1], [0, 0, 1, 1], [], []>} : vector<18x16xf32>, vector<16x32xf32>, vector<18x32xf32> -> vector<18x32xf32>
    %130 = vector.broadcast %8 : vector<1x32xf32> to vector<18x32xf32>
    %131 = arith.mulf %129, %130 : vector<18x32xf32>
    %132 = vector.broadcast %9 : vector<1x32xf32> to vector<18x32xf32>
    %133 = arith.addf %131, %132 : vector<18x32xf32>
    %cst_61 = arith.constant 0.000000e+00 : f32
    %134 = vector.broadcast %cst_61 : f32 to vector<18x32xf32>
    %135 = arith.maximumf %133, %134 : vector<18x32xf32>
    %cst_62 = arith.constant 0.000000e+00 : f32
    %136 = vector.broadcast %cst_62 : f32 to vector<18x32xf32>
    %137 = arith.select %6, %135, %136 : vector<18x32xi1>, vector<18x32xf32>
    %c1_i32_63 = arith.constant 1 : i32
    %138 = arith.cmpi sge, %125, %c1_i32_63 : i32
    %c17_i32_64 = arith.constant 17 : i32
    %139 = arith.cmpi slt, %125, %c17_i32_64 : i32
    %140 = arith.andi %138, %139 : i1
    %141 = arith.extui %140 : i1 to i32
    %142 = arith.sitofp %141 : i32 to f32
    %143 = vector.broadcast %142 : f32 to vector<18x32xf32>
    %144 = arith.mulf %137, %143 : vector<18x32xf32>
    %c5 = arith.constant 5 : index
    %c0_65 = arith.constant 0 : index
    %c0_66 = arith.constant 0 : index
    %145 = vector.load %arg13[%c5, %c0_65, %c0_66] : memref<6x18x32xf32, #tpu.memory_space<vmem>>, vector<1x18x32xf32>
    %146 = vector.shape_cast %145 : vector<1x18x32xf32> to vector<18x32xf32>
    %147 = vector.shape_cast %144 : vector<18x32xf32> to vector<1x18x32xf32>
    tpu.vector_store %arg13[%c5, %c0_65, %c0_66], %147 {strides = array<i32>} : memref<6x18x32xf32, #tpu.memory_space<vmem>>, vector<1x18x32xf32>,
    %c0_67 = arith.constant 0 : index
    %c0_68 = arith.constant 0 : index
    %148 = vector.load %arg7[%c0_67, %c0_68] : memref<1x32xf32, #tpu.memory_space<vmem>>, vector<1x32xf32>
    %c0_69 = arith.constant 0 : index
    %c0_70 = arith.constant 0 : index
    %149 = vector.load %arg8[%c0_69, %c0_70] : memref<1x32xf32, #tpu.memory_space<vmem>>, vector<1x32xf32>
    %cst_71 = arith.constant 0.000000e+00 : f32
    %150 = vector.broadcast %cst_71 : f32 to vector<4x16x32xf32>
    %c0_72 = arith.constant 0 : index
    %c0_73 = arith.constant 0 : index
    %c0_74 = arith.constant 0 : index
    %151 = vector.load %arg13[%c0_72, %c0_73, %c0_74] : memref<6x18x32xf32, #tpu.memory_space<vmem>>, vector<4x16x32xf32>
    %c0_75 = arith.constant 0 : index
    %c0_76 = arith.constant 0 : index
    %c0_77 = arith.constant 0 : index
    %152 = vector.load %arg6[%c0_75, %c0_76, %c0_77] : memref<9x1x32xf32, #tpu.memory_space<vmem>>, vector<1x1x32xf32>
    %153 = vector.shape_cast %152 : vector<1x1x32xf32> to vector<1x32xf32>
    %154 = vector.shape_cast %153 : vector<1x32xf32> to vector<1x1x32xf32>
    %155 = vector.broadcast %154 : vector<1x1x32xf32> to vector<4x16x32xf32>
    %156 = arith.mulf %151, %155 : vector<4x16x32xf32>
    %157 = arith.addf %150, %156 : vector<4x16x32xf32>
    %c0_78 = arith.constant 0 : index
    %c1_79 = arith.constant 1 : index
    %c0_80 = arith.constant 0 : index
    %158 = vector.load %arg13[%c0_78, %c1_79, %c0_80] : memref<6x18x32xf32, #tpu.memory_space<vmem>>, vector<4x16x32xf32>
    %c1_81 = arith.constant 1 : index
    %c0_82 = arith.constant 0 : index
    %c0_83 = arith.constant 0 : index
    %159 = vector.load %arg6[%c1_81, %c0_82, %c0_83] : memref<9x1x32xf32, #tpu.memory_space<vmem>>, vector<1x1x32xf32>
    %160 = vector.shape_cast %159 : vector<1x1x32xf32> to vector<1x32xf32>
    %161 = vector.shape_cast %160 : vector<1x32xf32> to vector<1x1x32xf32>
    %162 = vector.broadcast %161 : vector<1x1x32xf32> to vector<4x16x32xf32>
    %163 = arith.mulf %158, %162 : vector<4x16x32xf32>
    %164 = arith.addf %157, %163 : vector<4x16x32xf32>
    %c0_84 = arith.constant 0 : index
    %c2_85 = arith.constant 2 : index
    %c0_86 = arith.constant 0 : index
    %165 = vector.load %arg13[%c0_84, %c2_85, %c0_86] : memref<6x18x32xf32, #tpu.memory_space<vmem>>, vector<4x16x32xf32>
    %c2_87 = arith.constant 2 : index
    %c0_88 = arith.constant 0 : index
    %c0_89 = arith.constant 0 : index
    %166 = vector.load %arg6[%c2_87, %c0_88, %c0_89] : memref<9x1x32xf32, #tpu.memory_space<vmem>>, vector<1x1x32xf32>
    %167 = vector.shape_cast %166 : vector<1x1x32xf32> to vector<1x32xf32>
    %168 = vector.shape_cast %167 : vector<1x32xf32> to vector<1x1x32xf32>
    %169 = vector.broadcast %168 : vector<1x1x32xf32> to vector<4x16x32xf32>
    %170 = arith.mulf %165, %169 : vector<4x16x32xf32>
    %171 = arith.addf %164, %170 : vector<4x16x32xf32>
    %c1_90 = arith.constant 1 : index
    %c0_91 = arith.constant 0 : index
    %c0_92 = arith.constant 0 : index
    %172 = vector.load %arg13[%c1_90, %c0_91, %c0_92] : memref<6x18x32xf32, #tpu.memory_space<vmem>>, vector<4x16x32xf32>
    %c3_93 = arith.constant 3 : index
    %c0_94 = arith.constant 0 : index
    %c0_95 = arith.constant 0 : index
    %173 = vector.load %arg6[%c3_93, %c0_94, %c0_95] : memref<9x1x32xf32, #tpu.memory_space<vmem>>, vector<1x1x32xf32>
    %174 = vector.shape_cast %173 : vector<1x1x32xf32> to vector<1x32xf32>
    %175 = vector.shape_cast %174 : vector<1x32xf32> to vector<1x1x32xf32>
    %176 = vector.broadcast %175 : vector<1x1x32xf32> to vector<4x16x32xf32>
    %177 = arith.mulf %172, %176 : vector<4x16x32xf32>
    %178 = arith.addf %171, %177 : vector<4x16x32xf32>
    %c1_96 = arith.constant 1 : index
    %c1_97 = arith.constant 1 : index
    %c0_98 = arith.constant 0 : index
    %179 = vector.load %arg13[%c1_96, %c1_97, %c0_98] : memref<6x18x32xf32, #tpu.memory_space<vmem>>, vector<4x16x32xf32>
    %c4_99 = arith.constant 4 : index
    %c0_100 = arith.constant 0 : index
    %c0_101 = arith.constant 0 : index
    %180 = vector.load %arg6[%c4_99, %c0_100, %c0_101] : memref<9x1x32xf32, #tpu.memory_space<vmem>>, vector<1x1x32xf32>
    %181 = vector.shape_cast %180 : vector<1x1x32xf32> to vector<1x32xf32>
    %182 = vector.shape_cast %181 : vector<1x32xf32> to vector<1x1x32xf32>
    %183 = vector.broadcast %182 : vector<1x1x32xf32> to vector<4x16x32xf32>
    %184 = arith.mulf %179, %183 : vector<4x16x32xf32>
    %185 = arith.addf %178, %184 : vector<4x16x32xf32>
    %c1_102 = arith.constant 1 : index
    %c2_103 = arith.constant 2 : index
    %c0_104 = arith.constant 0 : index
    %186 = vector.load %arg13[%c1_102, %c2_103, %c0_104] : memref<6x18x32xf32, #tpu.memory_space<vmem>>, vector<4x16x32xf32>
    %c5_105 = arith.constant 5 : index
    %c0_106 = arith.constant 0 : index
    %c0_107 = arith.constant 0 : index
    %187 = vector.load %arg6[%c5_105, %c0_106, %c0_107] : memref<9x1x32xf32, #tpu.memory_space<vmem>>, vector<1x1x32xf32>
    %188 = vector.shape_cast %187 : vector<1x1x32xf32> to vector<1x32xf32>
    %189 = vector.shape_cast %188 : vector<1x32xf32> to vector<1x1x32xf32>
    %190 = vector.broadcast %189 : vector<1x1x32xf32> to vector<4x16x32xf32>
    %191 = arith.mulf %186, %190 : vector<4x16x32xf32>
    %192 = arith.addf %185, %191 : vector<4x16x32xf32>
    %c2_108 = arith.constant 2 : index
    %c0_109 = arith.constant 0 : index
    %c0_110 = arith.constant 0 : index
    %193 = vector.load %arg13[%c2_108, %c0_109, %c0_110] : memref<6x18x32xf32, #tpu.memory_space<vmem>>, vector<4x16x32xf32>
    %c6 = arith.constant 6 : index
    %c0_111 = arith.constant 0 : index
    %c0_112 = arith.constant 0 : index
    %194 = vector.load %arg6[%c6, %c0_111, %c0_112] : memref<9x1x32xf32, #tpu.memory_space<vmem>>, vector<1x1x32xf32>
    %195 = vector.shape_cast %194 : vector<1x1x32xf32> to vector<1x32xf32>
    %196 = vector.shape_cast %195 : vector<1x32xf32> to vector<1x1x32xf32>
    %197 = vector.broadcast %196 : vector<1x1x32xf32> to vector<4x16x32xf32>
    %198 = arith.mulf %193, %197 : vector<4x16x32xf32>
    %199 = arith.addf %192, %198 : vector<4x16x32xf32>
    %c2_113 = arith.constant 2 : index
    %c1_114 = arith.constant 1 : index
    %c0_115 = arith.constant 0 : index
    %200 = vector.load %arg13[%c2_113, %c1_114, %c0_115] : memref<6x18x32xf32, #tpu.memory_space<vmem>>, vector<4x16x32xf32>
    %c7 = arith.constant 7 : index
    %c0_116 = arith.constant 0 : index
    %c0_117 = arith.constant 0 : index
    %201 = vector.load %arg6[%c7, %c0_116, %c0_117] : memref<9x1x32xf32, #tpu.memory_space<vmem>>, vector<1x1x32xf32>
    %202 = vector.shape_cast %201 : vector<1x1x32xf32> to vector<1x32xf32>
    %203 = vector.shape_cast %202 : vector<1x32xf32> to vector<1x1x32xf32>
    %204 = vector.broadcast %203 : vector<1x1x32xf32> to vector<4x16x32xf32>
    %205 = arith.mulf %200, %204 : vector<4x16x32xf32>
    %206 = arith.addf %199, %205 : vector<4x16x32xf32>
    %c2_118 = arith.constant 2 : index
    %c2_119 = arith.constant 2 : index
    %c0_120 = arith.constant 0 : index
    %207 = vector.load %arg13[%c2_118, %c2_119, %c0_120] : memref<6x18x32xf32, #tpu.memory_space<vmem>>, vector<4x16x32xf32>
    %c8 = arith.constant 8 : index
    %c0_121 = arith.constant 0 : index
    %c0_122 = arith.constant 0 : index
    %208 = vector.load %arg6[%c8, %c0_121, %c0_122] : memref<9x1x32xf32, #tpu.memory_space<vmem>>, vector<1x1x32xf32>
    %209 = vector.shape_cast %208 : vector<1x1x32xf32> to vector<1x32xf32>
    %210 = vector.shape_cast %209 : vector<1x32xf32> to vector<1x1x32xf32>
    %211 = vector.broadcast %210 : vector<1x1x32xf32> to vector<4x16x32xf32>
    %212 = arith.mulf %207, %211 : vector<4x16x32xf32>
    %213 = arith.addf %206, %212 : vector<4x16x32xf32>
    %214 = vector.shape_cast %148 : vector<1x32xf32> to vector<1x1x32xf32>
    %215 = vector.broadcast %214 : vector<1x1x32xf32> to vector<4x16x32xf32>
    %216 = arith.mulf %213, %215 : vector<4x16x32xf32>
    %217 = vector.shape_cast %149 : vector<1x32xf32> to vector<1x1x32xf32>
    %218 = vector.broadcast %217 : vector<1x1x32xf32> to vector<4x16x32xf32>
    %219 = arith.addf %216, %218 : vector<4x16x32xf32>
    %cst_123 = arith.constant 0.000000e+00 : f32
    %220 = vector.broadcast %cst_123 : f32 to vector<4x16x32xf32>
    %221 = arith.maximumf %219, %220 : vector<4x16x32xf32>
    %c0_124 = arith.constant 0 : index
    %c0_125 = arith.constant 0 : index
    %222 = vector.load %arg9[%c0_124, %c0_125] : memref<32x16xf32, #tpu.memory_space<vmem>>, vector<32x16xf32>
    %c0_126 = arith.constant 0 : index
    %c0_127 = arith.constant 0 : index
    %223 = vector.load %arg10[%c0_126, %c0_127] : memref<1x16xf32, #tpu.memory_space<vmem>>, vector<1x16xf32>
    %c0_128 = arith.constant 0 : index
    %c0_129 = arith.constant 0 : index
    %224 = vector.load %arg11[%c0_128, %c0_129] : memref<1x16xf32, #tpu.memory_space<vmem>>, vector<1x16xf32>
    %225 = vector.extract_strided_slice %221 {offsets = [0, 0, 0], sizes = [1, 16, 32], strides = [1, 1, 1]} : vector<4x16x32xf32> to vector<1x16x32xf32>
    %226 = vector.shape_cast %225 : vector<1x16x32xf32> to vector<16x32xf32>
    %cst_130 = arith.constant dense<0.000000e+00> : vector<16x16xf32>
    %227 = tpu.matmul %226, %222, %cst_130 {dimension_numbers = #tpu.dot_dimension_numbers<[1], [0], [0], [1], [0, 0, 1, 1], [], []>} : vector<16x32xf32>, vector<32x16xf32>, vector<16x16xf32> -> vector<16x16xf32>
    %228 = vector.broadcast %223 : vector<1x16xf32> to vector<16x16xf32>
    %229 = arith.mulf %227, %228 : vector<16x16xf32>
    %230 = vector.broadcast %224 : vector<1x16xf32> to vector<16x16xf32>
    %231 = arith.addf %229, %230 : vector<16x16xf32>
    %c0_i32_131 = arith.constant 0 : i32
    %232 = arith.addi %0, %c0_i32_131 : i32
    %c1_i32_132 = arith.constant 1 : i32
    %233 = arith.addi %232, %c1_i32_132 : i32
    %c0_133 = arith.constant 0 : index
    %234 = arith.index_cast %233 : i32 to index
    %c1_134 = arith.constant 1 : index
    %c0_135 = arith.constant 0 : index
    %235 = vector.load %arg2[%c0_133, %234, %c1_134, %c0_135] : memref<1x18x18x16xf32, #tpu.memory_space<vmem>>, vector<1x1x16x16xf32>
    %236 = vector.shape_cast %235 : vector<1x1x16x16xf32> to vector<16x16xf32>
    %237 = arith.addf %231, %236 : vector<16x16xf32>
    %c0_136 = arith.constant 0 : index
    %c0_137 = arith.constant 0 : index
    %c0_138 = arith.constant 0 : index
    %c0_139 = arith.constant 0 : index
    %238 = vector.load %arg12[%c0_136, %c0_137, %c0_138, %c0_139] : memref<1x4x16x16xf32, #tpu.memory_space<vmem>>, vector<1x1x16x16xf32>
    %239 = vector.shape_cast %238 : vector<1x1x16x16xf32> to vector<16x16xf32>
    %240 = vector.shape_cast %237 : vector<16x16xf32> to vector<1x1x16x16xf32>
    tpu.vector_store %arg12[%c0_136, %c0_137, %c0_138, %c0_139], %240 {strides = array<i32>} : memref<1x4x16x16xf32, #tpu.memory_space<vmem>>, vector<1x1x16x16xf32>,
    %241 = vector.extract_strided_slice %221 {offsets = [1, 0, 0], sizes = [1, 16, 32], strides = [1, 1, 1]} : vector<4x16x32xf32> to vector<1x16x32xf32>
    %242 = vector.shape_cast %241 : vector<1x16x32xf32> to vector<16x32xf32>
    %cst_140 = arith.constant dense<0.000000e+00> : vector<16x16xf32>
    %243 = tpu.matmul %242, %222, %cst_140 {dimension_numbers = #tpu.dot_dimension_numbers<[1], [0], [0], [1], [0, 0, 1, 1], [], []>} : vector<16x32xf32>, vector<32x16xf32>, vector<16x16xf32> -> vector<16x16xf32>
    %244 = vector.broadcast %223 : vector<1x16xf32> to vector<16x16xf32>
    %245 = arith.mulf %243, %244 : vector<16x16xf32>
    %246 = vector.broadcast %224 : vector<1x16xf32> to vector<16x16xf32>
    %247 = arith.addf %245, %246 : vector<16x16xf32>
    %c1_i32_141 = arith.constant 1 : i32
    %248 = arith.addi %0, %c1_i32_141 : i32
    %c1_i32_142 = arith.constant 1 : i32
    %249 = arith.addi %248, %c1_i32_142 : i32
    %c0_143 = arith.constant 0 : index
    %250 = arith.index_cast %249 : i32 to index
    %c1_144 = arith.constant 1 : index
    %c0_145 = arith.constant 0 : index
    %251 = vector.load %arg2[%c0_143, %250, %c1_144, %c0_145] : memref<1x18x18x16xf32, #tpu.memory_space<vmem>>, vector<1x1x16x16xf32>
    %252 = vector.shape_cast %251 : vector<1x1x16x16xf32> to vector<16x16xf32>
    %253 = arith.addf %247, %252 : vector<16x16xf32>
    %c0_146 = arith.constant 0 : index
    %c1_147 = arith.constant 1 : index
    %c0_148 = arith.constant 0 : index
    %c0_149 = arith.constant 0 : index
    %254 = vector.load %arg12[%c0_146, %c1_147, %c0_148, %c0_149] : memref<1x4x16x16xf32, #tpu.memory_space<vmem>>, vector<1x1x16x16xf32>
    %255 = vector.shape_cast %254 : vector<1x1x16x16xf32> to vector<16x16xf32>
    %256 = vector.shape_cast %253 : vector<16x16xf32> to vector<1x1x16x16xf32>
    tpu.vector_store %arg12[%c0_146, %c1_147, %c0_148, %c0_149], %256 {strides = array<i32>} : memref<1x4x16x16xf32, #tpu.memory_space<vmem>>, vector<1x1x16x16xf32>,
    %257 = vector.extract_strided_slice %221 {offsets = [2, 0, 0], sizes = [1, 16, 32], strides = [1, 1, 1]} : vector<4x16x32xf32> to vector<1x16x32xf32>
    %258 = vector.shape_cast %257 : vector<1x16x32xf32> to vector<16x32xf32>
    %cst_150 = arith.constant dense<0.000000e+00> : vector<16x16xf32>
    %259 = tpu.matmul %258, %222, %cst_150 {dimension_numbers = #tpu.dot_dimension_numbers<[1], [0], [0], [1], [0, 0, 1, 1], [], []>} : vector<16x32xf32>, vector<32x16xf32>, vector<16x16xf32> -> vector<16x16xf32>
    %260 = vector.broadcast %223 : vector<1x16xf32> to vector<16x16xf32>
    %261 = arith.mulf %259, %260 : vector<16x16xf32>
    %262 = vector.broadcast %224 : vector<1x16xf32> to vector<16x16xf32>
    %263 = arith.addf %261, %262 : vector<16x16xf32>
    %c2_i32_151 = arith.constant 2 : i32
    %264 = arith.addi %0, %c2_i32_151 : i32
    %c1_i32_152 = arith.constant 1 : i32
    %265 = arith.addi %264, %c1_i32_152 : i32
    %c0_153 = arith.constant 0 : index
    %266 = arith.index_cast %265 : i32 to index
    %c1_154 = arith.constant 1 : index
    %c0_155 = arith.constant 0 : index
    %267 = vector.load %arg2[%c0_153, %266, %c1_154, %c0_155] : memref<1x18x18x16xf32, #tpu.memory_space<vmem>>, vector<1x1x16x16xf32>
    %268 = vector.shape_cast %267 : vector<1x1x16x16xf32> to vector<16x16xf32>
    %269 = arith.addf %263, %268 : vector<16x16xf32>
    %c0_156 = arith.constant 0 : index
    %c2_157 = arith.constant 2 : index
    %c0_158 = arith.constant 0 : index
    %c0_159 = arith.constant 0 : index
    %270 = vector.load %arg12[%c0_156, %c2_157, %c0_158, %c0_159] : memref<1x4x16x16xf32, #tpu.memory_space<vmem>>, vector<1x1x16x16xf32>
    %271 = vector.shape_cast %270 : vector<1x1x16x16xf32> to vector<16x16xf32>
    %272 = vector.shape_cast %269 : vector<16x16xf32> to vector<1x1x16x16xf32>
    tpu.vector_store %arg12[%c0_156, %c2_157, %c0_158, %c0_159], %272 {strides = array<i32>} : memref<1x4x16x16xf32, #tpu.memory_space<vmem>>, vector<1x1x16x16xf32>,
    %273 = vector.extract_strided_slice %221 {offsets = [3, 0, 0], sizes = [1, 16, 32], strides = [1, 1, 1]} : vector<4x16x32xf32> to vector<1x16x32xf32>
    %274 = vector.shape_cast %273 : vector<1x16x32xf32> to vector<16x32xf32>
    %cst_160 = arith.constant dense<0.000000e+00> : vector<16x16xf32>
    %275 = tpu.matmul %274, %222, %cst_160 {dimension_numbers = #tpu.dot_dimension_numbers<[1], [0], [0], [1], [0, 0, 1, 1], [], []>} : vector<16x32xf32>, vector<32x16xf32>, vector<16x16xf32> -> vector<16x16xf32>
    %276 = vector.broadcast %223 : vector<1x16xf32> to vector<16x16xf32>
    %277 = arith.mulf %275, %276 : vector<16x16xf32>
    %278 = vector.broadcast %224 : vector<1x16xf32> to vector<16x16xf32>
    %279 = arith.addf %277, %278 : vector<16x16xf32>
    %c3_i32_161 = arith.constant 3 : i32
    %280 = arith.addi %0, %c3_i32_161 : i32
    %c1_i32_162 = arith.constant 1 : i32
    %281 = arith.addi %280, %c1_i32_162 : i32
    %c0_163 = arith.constant 0 : index
    %282 = arith.index_cast %281 : i32 to index
    %c1_164 = arith.constant 1 : index
    %c0_165 = arith.constant 0 : index
    %283 = vector.load %arg2[%c0_163, %282, %c1_164, %c0_165] : memref<1x18x18x16xf32, #tpu.memory_space<vmem>>, vector<1x1x16x16xf32>
    %284 = vector.shape_cast %283 : vector<1x1x16x16xf32> to vector<16x16xf32>
    %285 = arith.addf %279, %284 : vector<16x16xf32>
    %c0_166 = arith.constant 0 : index
    %c3_167 = arith.constant 3 : index
    %c0_168 = arith.constant 0 : index
    %c0_169 = arith.constant 0 : index
    %286 = vector.load %arg12[%c0_166, %c3_167, %c0_168, %c0_169] : memref<1x4x16x16xf32, #tpu.memory_space<vmem>>, vector<1x1x16x16xf32>
    %287 = vector.shape_cast %286 : vector<1x1x16x16xf32> to vector<16x16xf32>
    %288 = vector.shape_cast %285 : vector<16x16xf32> to vector<1x1x16x16xf32>
    tpu.vector_store %arg12[%c0_166, %c3_167, %c0_168, %c0_169], %288 {strides = array<i32>} : memref<1x4x16x16xf32, #tpu.memory_space<vmem>>, vector<1x1x16x16xf32>,
    return
  }
  func.func @transform_0(%arg0: i32, %arg1: i32) -> (i32, i32, i32, i32) {
    %c0_i32 = arith.constant 0 : i32
    %c0_i32_0 = arith.constant 0 : i32
    %c0_i32_1 = arith.constant 0 : i32
    %c0_i32_2 = arith.constant 0 : i32
    return %arg0, %c0_i32, %c0_i32_0, %c0_i32_1 : i32, i32, i32, i32
  }
  func.func @transform_1(%arg0: i32, %arg1: i32) -> (i32, i32) {
    %c0_i32 = arith.constant 0 : i32
    %c0_i32_0 = arith.constant 0 : i32
    %c0_i32_1 = arith.constant 0 : i32
    return %c0_i32, %c0_i32_0 : i32, i32
  }
  func.func @transform_2(%arg0: i32, %arg1: i32) -> (i32, i32) {
    %c0_i32 = arith.constant 0 : i32
    %c0_i32_0 = arith.constant 0 : i32
    %c0_i32_1 = arith.constant 0 : i32
    return %c0_i32, %c0_i32_0 : i32, i32
  }
  func.func @transform_3(%arg0: i32, %arg1: i32) -> (i32, i32) {
    %c0_i32 = arith.constant 0 : i32
    %c0_i32_0 = arith.constant 0 : i32
    %c0_i32_1 = arith.constant 0 : i32
    return %c0_i32, %c0_i32_0 : i32, i32
  }
  func.func @transform_4(%arg0: i32, %arg1: i32) -> (i32, i32, i32) {
    %c0_i32 = arith.constant 0 : i32
    %c0_i32_0 = arith.constant 0 : i32
    %c0_i32_1 = arith.constant 0 : i32
    %c0_i32_2 = arith.constant 0 : i32
    return %c0_i32, %c0_i32_0, %c0_i32_1 : i32, i32, i32
  }
  func.func @transform_5(%arg0: i32, %arg1: i32) -> (i32, i32) {
    %c0_i32 = arith.constant 0 : i32
    %c0_i32_0 = arith.constant 0 : i32
    %c0_i32_1 = arith.constant 0 : i32
    return %c0_i32, %c0_i32_0 : i32, i32
  }
  func.func @transform_6(%arg0: i32, %arg1: i32) -> (i32, i32) {
    %c0_i32 = arith.constant 0 : i32
    %c0_i32_0 = arith.constant 0 : i32
    %c0_i32_1 = arith.constant 0 : i32
    return %c0_i32, %c0_i32_0 : i32, i32
  }
  func.func @transform_7(%arg0: i32, %arg1: i32) -> (i32, i32) {
    %c0_i32 = arith.constant 0 : i32
    %c0_i32_0 = arith.constant 0 : i32
    %c0_i32_1 = arith.constant 0 : i32
    return %c0_i32, %c0_i32_0 : i32, i32
  }
  func.func @transform_8(%arg0: i32, %arg1: i32) -> (i32, i32) {
    %c0_i32 = arith.constant 0 : i32
    %c0_i32_0 = arith.constant 0 : i32
    %c0_i32_1 = arith.constant 0 : i32
    return %c0_i32, %c0_i32_0 : i32, i32
  }
  func.func @transform_9(%arg0: i32, %arg1: i32) -> (i32, i32) {
    %c0_i32 = arith.constant 0 : i32
    %c0_i32_0 = arith.constant 0 : i32
    %c0_i32_1 = arith.constant 0 : i32
    return %c0_i32, %c0_i32_0 : i32, i32
  }
  func.func @transform_10(%arg0: i32, %arg1: i32) -> (i32, i32, i32, i32) {
    %c0_i32 = arith.constant 0 : i32
    %c0_i32_0 = arith.constant 0 : i32
    %c0_i32_1 = arith.constant 0 : i32
    return %arg0, %arg1, %c0_i32, %c0_i32_0 : i32, i32, i32, i32
  }
}

</mosaic_0001>

<bundles_post_ra>
// kernel: tpu_custom_call.1
= control target key start
LH: loop header
LB: loop body
LE: loop exit
PB: predicated region body
PF: predicated region fallthrough
CT: control target
= control target key end

     0   :  { %s3228_s0 = inlined_call_operand.vmem [shape: f32[2,18,18,16], index: 0, kind: input, shape index: {}]   ;;  %s3229_s1 = inlined_call_operand.vmem [shape: f32[16,32], index: 1, kind: input, shape index: {}]   ;;  %s3230_s2 = inlined_call_operand.vmem [shape: f32[1,32], index: 2, kind: input, shape index: {}]   ;;  %s3231_s3 = inlined_call_operand.vmem [shape: f32[1,32], index: 3, kind: input, shape index: {}]   ;;  %s3232_s4 = inlined_call_operand.vmem [shape: f32[9,1,32], index: 4, kind: input, shape index: {}]   ;;  %s3233_s5 = inlined_call_operand.vmem [shape: f32[1,32], index: 5, kind: input, shape index: {}]   ;;  %s3234_s6 = inlined_call_operand.vmem [shape: f32[1,32], index: 6, kind: input, shape index: {}]   ;;  %s3235_s7 = inlined_call_operand.vmem [shape: f32[32,16], index: 7, kind: input, shape index: {}]   ;;  %s3236_s8 = inlined_call_operand.vmem [shape: f32[1,16], index: 8, kind: input, shape index: {}]   ;;  %s3237_s9 = inlined_call_operand.vmem [shape: f32[1,16], index: 9, kind: input, shape index: {}]   ;;  %s3238_s10 = inlined_call_operand.hbm [shape: f32[2,16,16,16], index: 10, kind: output, shape index: {}]  }
   0x1   :  { %3243 = sst [smem:[#allocation10_spill]] %s3228_s0 }
   0x2   :  { %3244 = sst [smem:[#allocation11_spill]] %s3229_s1 }
   0x3   :  { %3245 = sst [smem:[#allocation12_spill]] %s3235_s7 }
   0x4   :  { %15 = vsyncpa [#allocation4], 0 }
   0x5   :  { %17 = vsyncpa [#allocation4 + $0x1], 0  ;;  %s2526_s13 = smov 0   ;;  %s2528_s14 = smov 0  }
   0x6   :  { %s2530_s15 = smov 0   ;;  %s2532_s16 = smov 0  }
   0x7   :  { %s2534_s17 = smov 0   ;;  %s2536_s18 = smov 0  }
   0x8   :  { %s2538_s19 = smov 0   ;;  %s2540_s20 = smov 0  }
   0x9 LB: > { %3246 = sst [smem:[#allocation6_spill]] %s2455_s18  ;;  %s1955_s21 = sadd.s32 4294967295, %s2463_s20   ;;  %s2463_s20 = sphi %s2540_s20, %s23_s20   ;;  %s2459_s19 = sphi %s2538_s19, %s3266_s19   ;;  %s2455_s18 = sphi %s2536_s18, %s3265_s18   ;;  %s2451_s17 = sphi %s2534_s17, %s3264_s17   ;;  %s2447_s16 = sphi %s2532_s16, %s3263_s16   ;;  %s2443_s15 = sphi %s2530_s15, %s3269_s15   ;;  %s2439_s14 = sphi %s2528_s14, %s3268_s14   ;;  %s2435_s13 = sphi %s2526_s13, %s3267_s13  }
   0xa   : > { %3247 = sst [smem:[#allocation7_spill]] %s2459_s19  ;;  %s1956_s22 = sadd.s32 4294967294, %s2463_s20  }
   0xb   : > { %s32_s23 = sadd.s32 1, %s2455_s18  ;;  %s35_s24 = sadd.s32 1, %s2459_s19 }
   0xc   : > { %p33_p0 = scmp.ge.s32.totalorder %s32_s23, 4  ;;  %p269_p1 = scmp.ne.s32.totalorder %s2443_s15, %s2439_s14 }
   0xd   : > { %p270_p2 = scmp.eq.s32.totalorder %s1955_s21, 7  ;;  %p275_p5 = scmp.ne.s32.totalorder %s2439_s14, %s2435_s13 }
   0xe   : > { %s3271_s23 = smov (%p33_p0, %s32_s23), 0  ;;  %s3273_s24 = smov (!%p33_p0, %s35_s24), %s2459_s19 }
   0xf   : > { %3248 = sst [smem:[#allocation8_spill]] %s3271_s23  ;;  %s255_s25 = ssub.s32 %s2455_s18, %s3271_s23 }
  0x10   : > { %p2577_p3 = por %p270_p2, %p269_p1  ;;  %p37_p4 = scmp.ge.s32.totalorder %s3273_s24, 2 }
  0x11   : > { %p276_p6 = scmp.eq.s32.totalorder %s1956_s22, 7  ;;  %p1959_p7 = scmp.ge.s32.totalorder %s2463_s20, 1 }
  0x12   : > { %s3275_s24 = smov (%p37_p4, %s3273_s24), 0  ;;  %p329_p9 = scmp.lt.s32.totalorder %s2463_s20, 9 }
  0x13   : > { %3250 = sst [smem:[#allocation9_spill]] %s3275_s24  ;;  %p2586_p8 = por %p276_p6, %p275_p5 }
  0x14   : > { %s254_s28 = ssub.s32 %s2459_s19, %s3275_s24  ;;  %s259_s29 = sadd.s32 1, %s2443_s15 }
  0x15   : > { %s256_s30 = sor.u32 %s255_s25, %s254_s28  ;;  %p330_p10 = pnand %p1959_p7, %p329_p9 }
  0x16   : > { %p257_p11 = scmp.eq.s32.totalorder %s256_s30, 0  ;;  %s3252_s1 = sld [smem:[#allocation11_spill]] (!%p330_p10)  ;;  %v2465_v2 = vmov (!%p330_p10), 0.0|0.0   ;;  %vm2466_vm0 = vmmov (!%p330_p10), 0   ;;  %v2467_v4 = vmov (!%p330_p10), 0.0   ;;  %vm396_vm1 = vcmask (!%p330_p10), 130048  }
  0x17   : > { %333 = sbr.rel (%p330_p10) target bundleno = 565 (0x235), region = 60  ;;  %p367_p12 = scmp.lt.s32.totalorder (!%p330_p10), %s2451_s17, 1  ;;  %2242 = vmatprep.subr.bf16.mxu0 (!%p330_p10), %v2465_v2  ;;  %2245 = vmatprep.subr.bf16.mxu1 (!%p330_p10), %v2465_v2  ;;  %v374_v29 = vlaneseq (!%p330_p10)  ;;  %v2723_v30 = vld [vmem:[%s3230_s2] ss:$0 sm:$0xff] (!%p330_p10)  ;;  %vm520_vm3 = vcmask (!%p330_p10), 261120   ;;  %vm523_vm5 = vcmask (!%p330_p10), 254976  }
  0x18   : > { %s2595_s11 = scalar_select %p257_p11, %s2443_s15, %s259_s29  }
  0x19   : > { %2124 = vmatprep.mubr.msk.f32.mxu0 (!%p330_p10), %vm2466_vm0, %v2467_v4  ;;  %2137 = vmatprep.mubr.msk.f32.mxu1 (!%p330_p10), %vm2466_vm0, %v2467_v4  ;;  %s1963_s28 = smul.u32 (!%p330_p10), 96, %s2447_s16  ;;  %s3253_s0 = sld [smem:[#allocation10_spill]] (!%p330_p10)  ;;  %v2730_v31 = vshrl.u32 (!%p330_p10), %v374_v29, 7  ;;  %v2740_v32 = vld [vmem:[%s3231_s3] ss:$0 sm:$0xff] (!%p330_p10) }
  0x1a   : > { %s3254_s7 = sld [smem:[#allocation12_spill]] (!%p330_p10) }
  0x1b   : > { %vm378_vm2 = vcmp.ge.s32.totalorder (!%p330_p10), %v2730_v31, 1  ;;  %v2803_v57 = vadd.s32 (!%p330_p10), 16, %v2730_v31  ;;  %v2972_v31 = vld [vmem:[%s3232_s4 + $0x8] ss:$0 sm:$0xff] (!%p330_p10) }
  0x1c   : > { %v387_v0 = vld [vmem:[%s3252_s1] sm:$0xff] (!%p330_p10)  ;;  %v388_v1 = vld [vmem:[%s3252_s1 + $0x8] sm:$0xff] (!%p330_p10) }
  0x1d   : > { %v2243_v3 = vpack.c.bf16 (!%p330_p10), %v388_v1, %v387_v0  ;;  %vm383_vm4 = vcmp.lt.s32.totalorder (!%p330_p10), %v2803_v57, 17 }
  0x1e   : > { %s368_s25 = scalar_select %p367_p12, %s2451_s17, 1 }
  0x1f   : > { %2244 = vmatpush3.bf16.msra.mxu0 %v2243_v3  ;;  %2247 = vmatpush3.bf16.msra.mxu1 %v2243_v3 }
  0x20   : > { %2248 = vmatprep.subr.bf16.mxu0 %v2465_v2  ;;  %s2292_s23 = smul.u32 432, %s368_s25  ;;  %2251 = vmatprep.subr.bf16.mxu1 %v2465_v2  ;;  %v1455_v23 = vld [vmem:[%s3254_s7] sm:$0xff]  ;;  %v1456_v24 = vld [vmem:[%s3254_s7 + $0x8] sm:$0xff]  ;;  %v1457_v26 = vld [vmem:[%s3254_s7 + $0x10] sm:$0xff]  ;;  %s2710_s25 = sshll.u32 %s2447_s16, 2 }
  0x21   : > { %v2689_v25 = vpack.c.bf16 %v1456_v24, %v1455_v23  ;;  %v1458_v27 = vld [vmem:[%s3254_s7 + $0x18] sm:$0xff]  ;;  %p510_p13 = scmp.ge.s32.totalorder %s2710_s25, 1  ;;  %p511_p0 = scmp.lt.s32.totalorder %s2710_s25, 17  ;;  %v2854_v24 = vld [vmem:[%s3232_s4] ss:$0 sm:$0xff] }
  0x22   : > { %s371_s12 = scalar_lea.vmem %s3253_s0, %s2292_s23  ;;  %v2701_v28 = vpack.c.bf16 %v1458_v27, %v1457_v26  ;;  %s646_s30 = sadd.s32 2, %s2710_s25  ;;  %v2859_v26 = vld [vmem:[%s3232_s4 + $0x3] ss:$0 sm:$0xff] }
  0x23   : > { %s2613_s21 = scalar_lea.vmem %s371_s12, %s1963_s28  ;;  %s525_s28 = sadd.s32 1, %s2710_s25 }
  0x24   : > { %v393_v5 = vld [vmem:[%s2613_s21] sm:$0xff]  ;;  %v1972_v6 = vld [vmem:[%s2613_s21 + $0x18] sm:$0xff]  ;;  %v394_v7 = vld [vmem:[%s2613_s21 + $0x8] sm:$0xff]  ;;  %p632_p1 = scmp.ge.s32.totalorder %s525_s28, 1  ;;  %p633_p2 = scmp.lt.s32.totalorder %s525_s28, 17 }
  0x25   : > { %2125 = vmatmul.mubr.msk.f32.vlgmr.msra.gmra.mrb[0].mxu0 %vm396_vm1, %v393_v5  ;;  %2138 = vmatmul.mubr.msk.f32.vlgmr.msra.gmra.mrb[0].mxu1 %vm396_vm1, %v1972_v6  ;;  %v1973_v8 = vld [vmem:[%s2613_s21 + $0x20] sm:$0xff]  ;;  %v395_v9 = vld [vmem:[%s2613_s21 + $0x10] sm:$0x3]  ;;  %v1974_v10 = vld [vmem:[%s2613_s21 + $0x28] sm:$0x3]  ;;  %p512_p4 = pnand %p511_p0, %p510_p13  ;;  %s767_s0 = sadd.s32 3, %s2710_s25 }
  0x26   : > { %2250 = vmatpush3.bf16.msra.mxu0 %v2243_v3  ;;  %2127 = vmatprep.mubr.msk.f32.mxu0 %vm2466_vm0, %v2467_v4  ;;  %v1981_v11 = vld [vmem:[%s2613_s21 + $0x30] sm:$0xff]  ;;  %v1990_v12 = vld [vmem:[%s2613_s21 + $0x48] sm:$0xff]  ;;  %v1982_v13 = vld [vmem:[%s2613_s21 + $0x38] sm:$0xff]  ;;  %p634_p5 = pnand %p633_p2, %p632_p1  ;;  %p2725_p6 = scmp.ge.s32.totalorder %s646_s30, 1 }
  0x27   : > { %2140 = vmatprep.mubr.msk.f32.mxu1 %vm2466_vm0, %v2467_v4  ;;  %2253 = vmatpush3.bf16.msra.mxu1 %v2243_v3  ;;  %v1991_v14 = vld [vmem:[%s2613_s21 + $0x50] sm:$0xff]  ;;  %v1983_v15 = vld [vmem:[%s2613_s21 + $0x40] sm:$0x3]  ;;  %v1992_v16 = vld [vmem:[%s2613_s21 + $0x58] sm:$0x3]  ;;  %s888_s28 = sadd.s32 4, %s2710_s25 }
  0x28   : > { %2254 = vmatprep.subr.bf16.mxu0 %v2465_v2  ;;  %2257 = vmatprep.subr.bf16.mxu1 %v2465_v2  ;;  %v1999_v17 = vld [vmem:[%s2613_s21 + $0x60] sm:$0xff]  ;;  %v2008_v18 = vld [vmem:[%s2613_s21 + $0x78] sm:$0xff]  ;;  %v2000_v19 = vld [vmem:[%s2613_s21 + $0x68] sm:$0xff]  ;;  %s1969_s23 = scalar_select %p512_p4, 0, 1 }
  0x29   : > { %2128 = vmatmul.mubr.msk.f32.gmra.mrb[2].mxu0 %vm396_vm1, %v394_v7  ;;  %2141 = vmatmul.mubr.msk.f32.gmra.mrb[2].mxu1 %vm396_vm1, %v1973_v8  ;;  %v2009_v20 = vld [vmem:[%s2613_s21 + $0x80] sm:$0xff]  ;;  %v2001_v21 = vld [vmem:[%s2613_s21 + $0x70] sm:$0x3]  ;;  %v2010_v22 = vld [vmem:[%s2613_s21 + $0x88] sm:$0x3]  ;;  %p2732_p7 = scmp.lt.s32.totalorder %s646_s30, 17 }
  0x2a   : > { %2130 = vmatprep.mubr.msk.f32.mxu0 %vm2466_vm0, %v2467_v4  ;;  %2143 = vmatprep.mubr.msk.f32.mxu1 %vm2466_vm0, %v2467_v4  ;;  %s2715_s29 = scalar_select %p634_p5, 0, 1 }
  0x2b   : > { %s515_s12 = scvt.s32.f32 %s1969_s23  ;;  %s1009_s18 = sadd.s32 5, %s2710_s25 }
  0x2c   : > { %s637_s22 = scvt.s32.f32 %s2715_s29  ;;  %p2742_p9 = scmp.ge.s32.totalorder %s767_s0, 1 }
  0x2d   : > { %2131 = vmatmul.mubr.msk.f32.gmra.mrb[4].mxu0 %vm396_vm1, %v395_v9  ;;  %2144 = vmatmul.mubr.msk.f32.gmra.mrb[4].mxu1 %vm396_vm1, %v1974_v10  ;;  %p2746_p10 = scmp.lt.s32.totalorder %s767_s0, 17  ;;  %p2752_p11 = scmp.ge.s32.totalorder %s888_s28, 1  ;;  %v516_v41 = vstv %s515_s12 }
  0x2e   : > { %2150 = vmatprep.mubr.msk.f32.mxu0 %vm2466_vm0, %v2467_v4  ;;  %2163 = vmatprep.mubr.msk.f32.mxu1 %vm2466_vm0, %v2467_v4  ;;  %p2756_p12 = scmp.lt.s32.totalorder %s888_s28, 17  ;;  %p2760_p13 = scmp.ge.s32.totalorder %s1009_s18, 1  ;;  %v638_v42 = vstv %s637_s22 }
  0x2f   : > { %p2764_p0 = scmp.lt.s32.totalorder %s1009_s18, 17  ;;  %p755_p1 = pnand %p2732_p7, %p2725_p6 }
  0x30   : > { %p876_p2 = pnand %p2746_p10, %p2742_p9  ;;  %p997_p4 = pnand %p2756_p12, %p2752_p11 }
  0x31   : > { %2151 = vmatmul.mubr.msk.f32.vlgmr.msra.gmra.mrb[6].mxu0 %vm396_vm1, %v1981_v11  ;;  %2164 = vmatmul.mubr.msk.f32.vlgmr.msra.gmra.mrb[6].mxu1 %vm396_vm1, %v1990_v12  ;;  %p1118_p5 = pnand %p2764_p0, %p2760_p13  ;;  %s2065_s0 = sshll.u32 %s2447_s16, 3 }
  0x32   : > { %2256 = vmatpush3.bf16.msra.mxu0 %v2243_v3  ;;  %2153 = vmatprep.mubr.msk.f32.mxu0 %vm2466_vm0, %v2467_v4  ;;  %s2800_s18 = scalar_select %p755_p1, 0, 1 }
  0x33   : > { %2166 = vmatprep.mubr.msk.f32.mxu1 %vm2466_vm0, %v2467_v4  ;;  %2259 = vmatpush3.bf16.msra.mxu1 %v2243_v3  ;;  %s2810_s12 = scalar_select %p876_p2, 0, 1 }
  0x34   : > { %2261 = vmatprep.subr.bf16.mxu0 %v2689_v25  ;;  %2269 = vmatprep.subr.bf16.mxu1 %v2689_v25  ;;  %s2819_s19 = scalar_select %p997_p4, 0, 1 }
  0x35   : > { %2154 = vmatmul.mubr.msk.f32.gmra.mrb[8].mxu0 %vm396_vm1, %v1982_v13  ;;  %2167 = vmatmul.mubr.msk.f32.gmra.mrb[8].mxu1 %vm396_vm1, %v1991_v14  ;;  %s2828_s24 = scalar_select %p1118_p5, 0, 1 }
  0x36   : > { %2156 = vmatprep.mubr.msk.f32.mxu0 %vm2466_vm0, %v2467_v4  ;;  %2169 = vmatprep.mubr.msk.f32.mxu1 %vm2466_vm0, %v2467_v4  ;;  %s758_s22 = scvt.s32.f32 %s2800_s18  ;;  %s879_s28 = scvt.s32.f32 %s2810_s12 }
  0x37   : > { %s1000_s29 = scvt.s32.f32 %s2819_s19  ;;  %s1121_s1 = scvt.s32.f32 %s2828_s24 }
  0x38   : > { %s2061_s23 = sshll.u32 %s2451_s17, 5 }
  0x39   : > { %2157 = vmatmul.mubr.msk.f32.gmra.mrb[10].mxu0 %vm396_vm1, %v1983_v15  ;;  %2170 = vmatmul.mubr.msk.f32.gmra.mrb[10].mxu1 %vm396_vm1, %v1992_v16  ;;  %s1854_s18 = sadd.s32 %s2065_s0, %s2061_s23 }
  0x3a   : > { %2176 = vmatprep.mubr.msk.f32.mxu0 %vm2466_vm0, %v2467_v4  ;;  %2189 = vmatprep.mubr.msk.f32.mxu1 %vm2466_vm0, %v2467_v4  ;;  %s2062_s12 = sshll.u32 %s1854_s18, 7 }
  0x3b   : > { %s3166_s24 = scalar_lea.hbm %s3238_s10, %s2062_s12 }
  0x3d   : > { %2177 = vmatmul.mubr.msk.f32.vlgmr.msra.gmra.mrb[12].mxu0 %vm396_vm1, %v1999_v17  ;;  %2190 = vmatmul.mubr.msk.f32.vlgmr.msra.gmra.mrb[12].mxu1 %vm396_vm1, %v2008_v18 }
  0x3e   : > { %2179 = vmatprep.mubr.msk.f32.mxu0 %vm2466_vm0, %v2467_v4  ;;  %2192 = vmatprep.mubr.msk.f32.mxu1 %vm2466_vm0, %v2467_v4 }
  0x3f   : > { %2263 = vmatpush3.bf16.msra.mxu0 %v2689_v25  ;;  %2271 = vmatpush3.bf16.msra.mxu1 %v2689_v25 }
  0x40   : > { %2265 = vmatprep.subr.bf16.mxu0 %v2701_v28  ;;  %2273 = vmatprep.subr.bf16.mxu1 %v2701_v28 }
  0x41   : > { %2180 = vmatmul.mubr.msk.f32.gmra.mrb[14].mxu0 %vm396_vm1, %v2000_v19  ;;  %2193 = vmatmul.mubr.msk.f32.gmra.mrb[14].mxu1 %vm396_vm1, %v2009_v20  ;;  %v2847_v20 = vstv %s758_s22  ;;  %s364_s22 = sand.u32 1, %s2439_s14  }
  0x42   : > { %2182 = vmatprep.mubr.msk.f32.mxu0 %vm2466_vm0, %v2467_v4  ;;  %2195 = vmatprep.mubr.msk.f32.mxu1 %vm2466_vm0, %v2467_v4  ;;  %s1960_s25 = sshll.u32 %s364_s22, 6 }
  0x43   : > { %2267 = vmatpush3.bf16.msra.mxu0 %v2701_v28  ;;  %2275 = vmatpush3.bf16.msra.mxu1 %v2701_v28  ;;  %s3140_s30 = scalar_lea.vmem [#allocation3], %s1960_s25 }
  0x44   : > { %2277 = vmatprep.subr.bf16.mxu0 %v2689_v25  ;;  %2285 = vmatprep.subr.bf16.mxu1 %v2689_v25  ;;  %s1857_s19 = sshll.u32 %s3140_s30, 4  ;;  %s3168_s19 = int_to_ptr.vmem [resolvable:$true] %s1857_s19 }
  0x45   : > { %2183 = vmatmul.mubr.msk.f32.gmra.mrb[16].mxu0 %vm396_vm1, %v2001_v21  ;;  %2196 = vmatmul.mubr.msk.f32.gmra.mrb[16].mxu1 %vm396_vm1, %v2010_v22  ;;  %v2849_v21 = vstv %s879_s28  ;;  %s3176_s28 = scalar_lea.sflag [#allocation4], %s364_s22 }
  0xf8   : > { %v472_v33 = vpop.f32.mrb[0].mxu0  ;;  %v606_v34 = vpop.f32.mrb[0].mxu1 }
  0xf9   : > { %v492_v35 = vmul.f32 %v2723_v30, %v472_v33  ;;  %v2126_v36 = vpop.f32.mrb[1].mxu0  ;;  %v620_v37 = vmul.f32 %v2723_v30, %v606_v34  ;;  %v2139_v38 = vpop.f32.mrb[1].mxu1 }
  0xfa   : > { %v2866_v38 = vld [vmem:[%s3232_s4 + $0x1] ss:$0 sm:$0xff] }
  0xfb   : > { %v501_v39 = vadd.f32 %v2740_v32, %v492_v35  ;;  %v623_v40 = vadd.f32 %v2740_v32, %v620_v37 }
  0xfc   : > { %v477_v43 = vpop.f32.mrb[2].mxu0  ;;  %v611_v44 = vpop.f32.mrb[2].mxu1 }
  0xfd   : > { %v504_v45 = vmax.f32 %v501_v39, 0.0  ;;  %v626_v46 = vmax.f32 %v623_v40, 0.0  ;;  %v493_v47 = vmul.f32 %v2723_v30, %v477_v43  ;;  %v2129_v48 = vpop.f32.mrb[3].mxu0  ;;  %v621_v49 = vmul.f32 %v2723_v30, %v611_v44  ;;  %v2142_v50 = vpop.f32.mrb[3].mxu1 }
  0xfe   : > { %v2870_v39 = vstv %s1000_s29  ;;  %v2872_v40 = vstv %s1121_s1  ;;  %v2893_v48 = vld [vmem:[%s3232_s4 + $0x5] ss:$0 sm:$0xff]  ;;  %s2468_s29 = smov [#allocation3]  }
  0xff   : > { %v507_v51 = vsel %vm378_vm2, %v504_v45, 0.0  ;;  %v629_v52 = vsel %vm378_vm2, %v626_v46, 0.0  ;;  %v502_v53 = vadd.f32 %v2740_v32, %v493_v47  ;;  %v624_v54 = vadd.f32 %v2740_v32, %v621_v49  ;;  %s2373_s1 = sshll.u32 %s2468_s29, 4  ;;  %s2374_s1 = int_to_ptr.vmem [resolvable:$false] %s2373_s1 }
 0x100   : > { %v517_v55 = vmul.f32 %v516_v41, %v507_v51  ;;  %v639_v56 = vmul.f32 %v638_v42, %v629_v52  ;;  %v482_v58 = vpop.f32.mrb[4].mxu0  ;;  %v616_v59 = vpop.f32.mrb[4].mxu1  ;;  %s2375_s7 = scalar_lea.vmem %s2374_s1, 2048  ;;  %p2376_p10 = scmp.lt.s32.totalorder %s3168_s19, %s2374_s1 }
 0x101   : > { %v505_v60 = vmax.f32 %v502_v53, 0.0  ;;  %v627_v61 = vmax.f32 %v624_v54, 0.0  ;;  %v494_v62 = vmul.f32 %v2723_v30, %v482_v58  ;;  %v622_v63 = vmul.f32 %v2723_v30, %v616_v59  ;;  %v2132_v0 = vpop.f32.mrb[5].mxu0  ;;  %v2145_v1 = vpop.f32.mrb[5].mxu1 }
 0x102   : > { %521 = vst.msk [vmem:[#allocation2] sm:$0xff] %vm520_vm3, %v517_v55  ;;  %643 = vst.msk [vmem:[#allocation2 + $0x18] sm:$0xff] %vm520_vm3, %v639_v56 }
 0x103   : > { %v518_v2 = vmul.f32 %v516_v41, %v505_v60  ;;  %v640_v3 = vmul.f32 %v638_v42, %v627_v61  ;;  %v503_v4 = vadd.f32 %v2740_v32, %v494_v62  ;;  %v625_v5 = vadd.f32 %v2740_v32, %v622_v63 }
 0x104   : > { %v727_v6 = vpop.f32.mrb[6].mxu0  ;;  %v848_v7 = vpop.f32.mrb[6].mxu1 }
 0x105   : > { %522 = vst.msk [vmem:[#allocation2 + $0x8] sm:$0xff] %vm520_vm3, %v518_v2  ;;  %644 = vst.msk [vmem:[#allocation2 + $0x20] sm:$0xff] %vm520_vm3, %v640_v3  ;;  %v506_v8 = vmax.f32 %v503_v4, 0.0  ;;  %v628_v9 = vmax.f32 %v625_v5, 0.0  ;;  %v741_v10 = vmul.f32 %v2723_v30, %v727_v6  ;;  %v2152_v11 = vpop.f32.mrb[7].mxu0  ;;  %v862_v12 = vmul.f32 %v2723_v30, %v848_v7  ;;  %v2165_v13 = vpop.f32.mrb[7].mxu1 }
 0x107   : > { %v509_v14 = vsel %vm383_vm4, %v506_v8, 0.0  ;;  %v631_v15 = vsel %vm383_vm4, %v628_v9, 0.0  ;;  %v744_v16 = vadd.f32 %v2740_v32, %v741_v10  ;;  %v865_v17 = vadd.f32 %v2740_v32, %v862_v12 }
 0x108   : > { %v519_v18 = vmul.f32 %v516_v41, %v509_v14  ;;  %v641_v19 = vmul.f32 %v638_v42, %v631_v15  ;;  %v732_v22 = vpop.f32.mrb[8].mxu0  ;;  %v853_v23 = vpop.f32.mrb[8].mxu1  ;;  %v2877_v41 = vld [vmem:[%s3232_s4 + $0x2] ss:$0 sm:$0xff]  ;;  %v2882_v42 = vld [vmem:[%s3232_s4 + $0x4] ss:$0 sm:$0xff] }
 0x109   : > { %v747_v27 = vmax.f32 %v744_v16, 0.0  ;;  %v868_v29 = vmax.f32 %v865_v17, 0.0  ;;  %v742_v33 = vmul.f32 %v2723_v30, %v732_v22  ;;  %v2155_v34 = vpop.f32.mrb[9].mxu0  ;;  %v863_v35 = vmul.f32 %v2723_v30, %v853_v23  ;;  %v2168_v36 = vpop.f32.mrb[9].mxu1  ;;  %v1132_v37 = vld [vmem:[#allocation2] sm:$0xff]  ;;  %v1227_v47 = vld [vmem:[#allocation2 + $0x18] sm:$0xff] }
 0x10a   : > { %524 = vst.msk [vmem:[#allocation2 + $0x10] sm:$0x3] %vm523_vm5, %v519_v18  ;;  %645 = vst.msk [vmem:[#allocation2 + $0x28] sm:$0x3] %vm523_vm5, %v641_v19  ;;  %v1147_v53 = vmul.f32 %v2854_v24, %v1132_v37  ;;  %v1243_v56 = vmul.f32 %v2859_v26, %v1227_v47  ;;  %v2911_v7 = vmul.f32 %v2854_v24, %v1227_v47 }
 0x10b   : > { %v750_v43 = vsel %vm378_vm2, %v747_v27, 0.0  ;;  %v871_v44 = vsel %vm378_vm2, %v868_v29, 0.0  ;;  %v745_v45 = vadd.f32 %v2740_v32, %v742_v33  ;;  %v866_v46 = vadd.f32 %v2740_v32, %v863_v35 }
 0x10c   : > { %v760_v49 = vmul.f32 %v2847_v20, %v750_v43  ;;  %v881_v50 = vmul.f32 %v2849_v21, %v871_v44  ;;  %v737_v51 = vpop.f32.mrb[10].mxu0  ;;  %v858_v52 = vpop.f32.mrb[10].mxu1  ;;  %v1163_v54 = vld [vmem:[#allocation2 + $0x1] sm:$0xff]  ;;  %v1259_v58 = vld [vmem:[#allocation2 + $0x19] sm:$0xff] }
 0x10d   : > { %v1195_v55 = vld [vmem:[#allocation2 + $0x2] sm:$0xff]  ;;  %v748_v59 = vmax.f32 %v745_v45, 0.0  ;;  %v869_v60 = vmax.f32 %v866_v46, 0.0  ;;  %v743_v61 = vmul.f32 %v2723_v30, %v737_v51  ;;  %v864_v62 = vmul.f32 %v2723_v30, %v858_v52  ;;  %v2158_v63 = vpop.f32.mrb[11].mxu0  ;;  %v2171_v0 = vpop.f32.mrb[11].mxu1  ;;  %v2901_v1 = vld [vmem:[#allocation2 + $0x1a] sm:$0xff] }
 0x10e   : > { %v1133_v2 = vld [vmem:[#allocation2 + $0x8] sm:$0xff]  ;;  %764 = vst.msk [vmem:[#allocation2 + $0x30] sm:$0xff] %vm520_vm3, %v760_v49  ;;  %885 = vst.msk [vmem:[#allocation2 + $0x48] sm:$0xff] %vm520_vm3, %v881_v50  ;;  %v1179_v3 = vmul.f32 %v2866_v38, %v1163_v54  ;;  %v1211_v4 = vmul.f32 %v2877_v41, %v1195_v55  ;;  %v1275_v5 = vmul.f32 %v2882_v42, %v1259_v58  ;;  %v2908_v6 = vld [vmem:[#allocation2 + $0x20] sm:$0xff] }
 0x10f   : > { %v761_v8 = vmul.f32 %v2847_v20, %v748_v59  ;;  %v882_v9 = vmul.f32 %v2849_v21, %v869_v60  ;;  %v746_v10 = vadd.f32 %v2740_v32, %v743_v61  ;;  %v867_v11 = vadd.f32 %v2740_v32, %v864_v62  ;;  %v2938_v49 = vld [vmem:[%s3232_s4 + $0x6] ss:$0 sm:$0xff] }
 0x110   : > { %v969_v12 = vpop.f32.mrb[12].mxu0  ;;  %v1090_v13 = vpop.f32.mrb[12].mxu1  ;;  %v1187_v14 = vadd.f32 %v1179_v3, %v1147_v53  ;;  %v1307_v15 = vmul.f32 %v2893_v48, %v2901_v1  ;;  %v1148_v16 = vmul.f32 %v2854_v24, %v1133_v2  ;;  %v1244_v17 = vmul.f32 %v2859_v26, %v2908_v6 }
 0x111   : > { %765 = vst.msk [vmem:[#allocation2 + $0x38] sm:$0xff] %vm520_vm3, %v761_v8  ;;  %886 = vst.msk [vmem:[#allocation2 + $0x50] sm:$0xff] %vm520_vm3, %v882_v9  ;;  %v749_v18 = vmax.f32 %v746_v10, 0.0  ;;  %v870_v19 = vmax.f32 %v867_v11, 0.0  ;;  %v983_v22 = vmul.f32 %v2723_v30, %v969_v12  ;;  %v2178_v23 = vpop.f32.mrb[13].mxu0  ;;  %v1104_v27 = vmul.f32 %v2723_v30, %v1090_v13  ;;  %v2191_v29 = vpop.f32.mrb[13].mxu1 }
 0x112   : > { %v1164_v33 = vld [vmem:[#allocation2 + $0x9] sm:$0xff]  ;;  %v1219_v35 = vadd.f32 %v1211_v4, %v1187_v14  ;;  %v1181_v43 = vmul.f32 %v2866_v38, %v1259_v58  ;;  %v2940_v50 = vld [vmem:[#allocation2 + $0x21] sm:$0xff] }
 0x113   : > { %v1196_v34 = vld [vmem:[#allocation2 + $0xa] sm:$0xff]  ;;  %v1180_v36 = vmul.f32 %v2866_v38, %v1164_v33  ;;  %v752_v44 = vsel %vm383_vm4, %v749_v18, 0.0  ;;  %v873_v45 = vsel %vm383_vm4, %v870_v19, 0.0  ;;  %v986_v46 = vadd.f32 %v2740_v32, %v983_v22 }
 0x114   : > { %v1212_v37 = vmul.f32 %v2877_v41, %v1196_v34  ;;  %v1107_v47 = vadd.f32 %v2740_v32, %v1104_v27  ;;  %v762_v51 = vmul.f32 %v2847_v20, %v752_v44  ;;  %v883_v52 = vmul.f32 %v2849_v21, %v873_v45  ;;  %v974_v53 = vpop.f32.mrb[14].mxu0  ;;  %v1095_v54 = vpop.f32.mrb[14].mxu1 }
 0x115   : > { %v1251_v55 = vadd.f32 %v1243_v56, %v1219_v35  ;;  %v1188_v58 = vadd.f32 %v1180_v36, %v1148_v16  ;;  %v989_v59 = vmax.f32 %v986_v46, 0.0  ;;  %v984_v60 = vmul.f32 %v2723_v30, %v974_v53  ;;  %v2181_v61 = vpop.f32.mrb[15].mxu0  ;;  %v2194_v0 = vpop.f32.mrb[15].mxu1  ;;  %v2946_v2 = vld [vmem:[#allocation2 + $0x30] sm:$0xff]  ;;  %v1292_v36 = vld [vmem:[#allocation2 + $0x22] sm:$0xff] }
 0x116   : > { %v1110_v62 = vmax.f32 %v1107_v47, 0.0  ;;  %v1105_v63 = vmul.f32 %v2723_v30, %v1095_v54  ;;  %766 = vst.msk [vmem:[#allocation2 + $0x40] sm:$0x3] %vm523_vm5, %v762_v51  ;;  %887 = vst.msk [vmem:[#allocation2 + $0x58] sm:$0x3] %vm523_vm5, %v883_v52  ;;  %v1339_v21 = vmul.f32 %v2938_v49, %v2946_v2  ;;  %v1276_v3 = vmul.f32 %v2882_v42, %v2940_v50 }
 0x117   : > { %v1283_v20 = vadd.f32 %v1275_v5, %v1251_v55  ;;  %v1220_v56 = vadd.f32 %v1212_v37, %v1188_v58  ;;  %v992_v4 = vsel %vm378_vm2, %v989_v59, 0.0  ;;  %v987_v8 = vadd.f32 %v2740_v32, %v984_v60  ;;  %v2963_v5 = vld [vmem:[%s3232_s4 + $0x7] ss:$0 sm:$0xff] }
 0x118   : > { %v1113_v9 = vsel %vm378_vm2, %v1110_v62, 0.0  ;;  %v1108_v10 = vadd.f32 %v2740_v32, %v1105_v63  ;;  %v1002_v11 = vmul.f32 %v2870_v39, %v992_v4  ;;  %v979_v13 = vpop.f32.mrb[16].mxu0  ;;  %v1100_v14 = vpop.f32.mrb[16].mxu1  ;;  %v2967_v18 = vld [vmem:[#allocation2 + $0x31] sm:$0xff]  ;;  %v1189_v44 = vadd.f32 %v1181_v43, %v2911_v7 }
 0x119   : > { %v1123_v12 = vmul.f32 %v2872_v40, %v1113_v9  ;;  %v1315_v16 = vadd.f32 %v1307_v15, %v1283_v20  ;;  %v1252_v19 = vadd.f32 %v1244_v17, %v1220_v56  ;;  %v990_v22 = vmax.f32 %v987_v8, 0.0  ;;  %v2184_v29 = vpop.f32.mrb[17].mxu0  ;;  %v2197_v34 = vpop.f32.mrb[17].mxu1  ;;  %v2976_v35 = vld [vmem:[#allocation2 + $0x32] sm:$0xff] }
 0x11a   : > { %v1111_v23 = vmax.f32 %v1108_v10, 0.0  ;;  %v985_v27 = vmul.f32 %v2723_v30, %v979_v13  ;;  %v1106_v33 = vmul.f32 %v2723_v30, %v1100_v14  ;;  %1006 = vst.msk [vmem:[#allocation2 + $0x60] sm:$0xff] %vm520_vm3, %v1002_v11  ;;  %v1371_v37 = vmul.f32 %v2963_v5, %v2967_v18  ;;  %v2987_v51 = vld [vmem:[#allocation2 + $0x38] sm:$0xff]  ;;  %v1325_v14 = vld [vmem:[#allocation2 + $0x48] sm:$0xff] }
 0x11b   : > { %1127 = vst.msk [vmem:[#allocation2 + $0x78] sm:$0xff] %vm520_vm3, %v1123_v12  ;;  %v1347_v15 = vadd.f32 %v1339_v21, %v1315_v16  ;;  %v1284_v17 = vadd.f32 %v1276_v3, %v1252_v19  ;;  %v1003_v45 = vmul.f32 %v2870_v39, %v990_v22  ;;  %v1403_v53 = vmul.f32 %v2972_v31, %v2976_v35  ;;  %v3018_v21 = vld [vmem:[%s3234_s6] ss:$0 sm:$0xff] }
 0x11c   : > { %v1124_v46 = vmul.f32 %v2872_v40, %v1111_v23  ;;  %v988_v30 = vadd.f32 %v2740_v32, %v985_v27  ;;  %v1109_v47 = vadd.f32 %v2740_v32, %v1106_v33  ;;  %v1308_v54 = vmul.f32 %v2893_v48, %v1292_v36  ;;  %v2999_v32 = vld [vmem:[%s3233_s5] ss:$0 sm:$0xff] }
 0x11d   : > { %v1379_v52 = vadd.f32 %v1371_v37, %v1347_v15  ;;  %v1213_v55 = vmul.f32 %v2877_v41, %v2901_v1  ;;  %1007 = vst.msk [vmem:[#allocation2 + $0x68] sm:$0xff] %vm520_vm3, %v1003_v45  ;;  %v3001_v58 = vld [vmem:[#allocation2 + $0x39] sm:$0xff]  ;;  %v1245_v59 = vmul.f32 %v2859_v26, %v2946_v2  ;;  %v1340_v1 = vmul.f32 %v2938_v49, %v2987_v51  ;;  %v1357_v37 = vld [vmem:[#allocation2 + $0x49] sm:$0xff] }
 0x11e   : > { %1128 = vst.msk [vmem:[#allocation2 + $0x80] sm:$0xff] %vm520_vm3, %v1124_v46  ;;  %v991_v7 = vmax.f32 %v988_v30, 0.0  ;;  %v1112_v43 = vmax.f32 %v1109_v47, 0.0  ;;  %v1316_v61 = vadd.f32 %v1308_v54, %v1284_v17  ;;  %v1372_v62 = vmul.f32 %v2963_v5, %v3001_v58  ;;  %v3009_v63 = vld [vmem:[#allocation2 + $0x3a] sm:$0xff]  ;;  %v1389_v17 = vld [vmem:[#allocation2 + $0x4a] sm:$0xff] }
 0x11f   : > { %v1411_v60 = vadd.f32 %v1403_v53, %v1379_v52  ;;  %v1221_v56 = vadd.f32 %v1213_v55, %v1189_v44  ;;  %v1277_v3 = vmul.f32 %v2882_v42, %v2967_v18  ;;  %v1404_v57 = vmul.f32 %v2972_v31, %v3009_v63  ;;  %v3044_v45 = vld [vmem:[#allocation2 + $0x50] sm:$0xff] }
 0x120   : > { %v994_v0 = vsel %vm383_vm4, %v991_v7, 0.0  ;;  %v1115_v20 = vsel %vm383_vm4, %v1112_v43, 0.0  ;;  %v1348_v10 = vadd.f32 %v1340_v1, %v1316_v61  ;;  %v1309_v19 = vmul.f32 %v2893_v48, %v2976_v35  ;;  %v3051_v52 = vld [vmem:[#allocation2 + $0x51] sm:$0xff] }
 0x121   : > { %v1004_v4 = vmul.f32 %v2870_v39, %v994_v0  ;;  %v1125_v8 = vmul.f32 %v2872_v40, %v1115_v20  ;;  %v1425_v9 = vmul.f32 %v2999_v32, %v1411_v60  ;;  %v1253_v11 = vadd.f32 %v1245_v59, %v1221_v56  ;;  %v1390_v7 = vld [vmem:[#allocation2 + $0x52] sm:$0xff]  ;;  %v1327_v20 = vld [vmem:[#allocation2 + $0x60] sm:$0xff] }
 0x122   : > { %v1380_v13 = vadd.f32 %v1372_v62, %v1348_v10  ;;  %v1150_v39 = vmul.f32 %v2854_v24, %v2908_v6  ;;  %v1182_v40 = vmul.f32 %v2866_v38, %v2940_v50  ;;  %v1341_v22 = vmul.f32 %v2938_v49, %v1325_v14 }
 0x123   : > { %1008 = vst.msk [vmem:[#allocation2 + $0x70] sm:$0x3] %vm523_vm5, %v1004_v4  ;;  %1129 = vst.msk [vmem:[#allocation2 + $0x88] sm:$0x3] %vm523_vm5, %v1125_v8  ;;  %v1439_v12 = vadd.f32 %v3018_v21, %v1425_v9  ;;  %v1285_v16 = vadd.f32 %v1277_v3, %v1253_v11  ;;  %v1214_v23 = vmul.f32 %v2877_v41, %v1292_v36 }
 0x124   : > { %v1412_v29 = vadd.f32 %v1404_v57, %v1380_v13  ;;  %v1190_v33 = vadd.f32 %v1182_v40, %v1150_v39  ;;  %v1246_v34 = vmul.f32 %v2859_v26, %v2987_v51  ;;  %v1278_v6 = vmul.f32 %v2882_v42, %v3001_v58  ;;  %v1359_v39 = vld [vmem:[#allocation2 + $0x61] sm:$0xff] }
 0x125   : > { %v1447_v27 = vmax.f32 %v1439_v12, 0.0  ;;  %v1317_v15 = vadd.f32 %v1309_v19, %v1285_v16  ;;  %v1151_v36 = vmul.f32 %v2854_v24, %v2946_v2  ;;  %v1183_v46 = vmul.f32 %v2866_v38, %v2967_v18 }
 0x126   : > { %v1426_v50 = vmul.f32 %v2999_v32, %v1412_v29  ;;  %v1222_v44 = vadd.f32 %v1214_v23, %v1190_v33  ;;  %v1373_v47 = vmul.f32 %v2963_v5, %v1357_v37  ;;  %v1215_v53 = vmul.f32 %v2877_v41, %v2976_v35 }
 0x127   : > { %2206 = vmatprep.mubr.msk.f32.mxu0 %vm520_vm3, %v1447_v27  ;;  %v1349_v30 = vadd.f32 %v1341_v22, %v1317_v15  ;;  %v1191_v43 = vadd.f32 %v1183_v46, %v1151_v36  ;;  %v1247_v59 = vmul.f32 %v2859_v26, %v1325_v14  ;;  %v1405_v2 = vmul.f32 %v2972_v31, %v1389_v17  ;;  %v1391_v27 = vld [vmem:[#allocation2 + $0x62] sm:$0xff] }
 0x128   : > { %v1440_v54 = vadd.f32 %v3018_v21, %v1426_v50  ;;  %v1254_v55 = vadd.f32 %v1246_v34, %v1222_v44  ;;  %v1310_v18 = vmul.f32 %v2893_v48, %v3009_v63  ;;  %v1342_v61 = vmul.f32 %v2938_v49, %v3044_v45 }
 0x129   : > { %v1381_v60 = vadd.f32 %v1373_v47, %v1349_v30  ;;  %v1374_v35 = vmul.f32 %v2963_v5, %v3051_v52  ;;  %v1223_v0 = vadd.f32 %v1215_v53, %v1191_v43  ;;  %v1406_v3 = vmul.f32 %v2972_v31, %v1390_v7  ;;  %v1328_v53 = vld [vmem:[#allocation2 + $0x68] sm:$0xff] }
 0x12a   : > { %v1448_v1 = vmax.f32 %v1440_v54, 0.0  ;;  %v1286_v62 = vadd.f32 %v1278_v6, %v1254_v55  ;;  %v1152_v4 = vmul.f32 %v2854_v24, %v2987_v51  ;;  %v1184_v8 = vmul.f32 %v2866_v38, %v3001_v58  ;;  %v1360_v54 = vld [vmem:[#allocation2 + $0x69] sm:$0xff] }
 0x12b   : > { %v1413_v56 = vadd.f32 %v1405_v2, %v1381_v60  ;;  %v1255_v10 = vadd.f32 %v1247_v59, %v1223_v0  ;;  %v1279_v57 = vmul.f32 %v2882_v42, %v1357_v37  ;;  %v1311_v11 = vmul.f32 %v2893_v48, %v1389_v17 }
 0x12c   : > { %2207 = vmatmul.mubr.msk.f32.vlgmr.msra.gmra.mrb[18].mxu0 %vm520_vm3, %v1448_v1  ;;  %v1318_v9 = vadd.f32 %v1310_v18, %v1286_v62  ;;  %v1343_v13 = vmul.f32 %v2938_v49, %v1327_v20  ;;  %v1192_v40 = vadd.f32 %v1184_v8, %v1152_v4  ;;  %v1216_v51 = vmul.f32 %v2877_v41, %v3009_v63  ;;  %v1392_v8 = vld [vmem:[#allocation2 + $0x6a] sm:$0xff] }
 0x12d   : > { %v1427_v12 = vmul.f32 %v2999_v32, %v1413_v56  ;;  %2279 = vmatpush3.bf16.msra.mxu0 %v2689_v25  ;;  %v1287_v16 = vadd.f32 %v1279_v57, %v1255_v10  ;;  %v1248_v19 = vmul.f32 %v2859_v26, %v3044_v45  ;;  %v1153_v22 = vmul.f32 %v2854_v24, %v1325_v14 }
 0x12e   : > { %v1350_v58 = vadd.f32 %v1342_v61, %v1318_v9  ;;  %2281 = vmatprep.subr.bf16.mxu0 %v2701_v28  ;;  %v1224_v29 = vadd.f32 %v1216_v51, %v1192_v40  ;;  %v1185_v33 = vmul.f32 %v2866_v38, %v1357_v37  ;;  %v1217_v34 = vmul.f32 %v2877_v41, %v1389_v17  ;;  %v1329_v61 = vld [vmem:[#allocation2 + $0x78] sm:$0xff] }
 0x12f   : > { %v1441_v23 = vadd.f32 %v3018_v21, %v1427_v12  ;;  %v1319_v6 = vadd.f32 %v1311_v11, %v1287_v16  ;;  %v1375_v63 = vmul.f32 %v2963_v5, %v1359_v39  ;;  %v1280_v50 = vmul.f32 %v2882_v42, %v3051_v52  ;;  %v1393_v51 = vld [vmem:[#allocation2 + $0x7a] sm:$0xff] }
 0x130   : > { %v1382_v15 = vadd.f32 %v1374_v35, %v1350_v58  ;;  %v1256_v36 = vadd.f32 %v1248_v19, %v1224_v29  ;;  %v1193_v14 = vadd.f32 %v1185_v33, %v1153_v22  ;;  %v1249_v46 = vmul.f32 %v2859_v26, %v1327_v20 }
 0x131   : > { %v1449_v44 = vmax.f32 %v1441_v23, 0.0  ;;  %2283 = vmatpush3.bf16.msra.mxu0 %v2701_v28  ;;  %v1351_v47 = vadd.f32 %v1343_v13, %v1319_v6  ;;  %v1407_v37 = vmul.f32 %v2972_v31, %v1391_v27  ;;  %v1312_v17 = vmul.f32 %v2893_v48, %v1390_v7  ;;  %v1330_v23 = vld [vmem:[#allocation2 + $0x80] sm:$0xff] }
 0x132   : > { %v1414_v30 = vadd.f32 %v1406_v3, %v1382_v15  ;;  %v1288_v55 = vadd.f32 %v1280_v50, %v1256_v36  ;;  %v1225_v43 = vadd.f32 %v1217_v34, %v1193_v14  ;;  %v1281_v59 = vmul.f32 %v2882_v42, %v1359_v39  ;;  %v1362_v6 = vld [vmem:[#allocation2 + $0x81] sm:$0xff] }
 0x133   : > { %2217 = vmatprep.mubr.msk.f32.mxu1 %vm520_vm3, %v1449_v44  ;;  %v1154_v60 = vmul.f32 %v2854_v24, %v3044_v45  ;;  %v1383_v18 = vadd.f32 %v1375_v63, %v1351_v47  ;;  %v1186_v1 = vmul.f32 %v2866_v38, %v3051_v52  ;;  %v1218_v62 = vmul.f32 %v2877_v41, %v1390_v7  ;;  %v1361_v7 = vld [vmem:[#allocation2 + $0x79] sm:$0xff]  ;;  %v1394_v36 = vld [vmem:[#allocation2 + $0x82] sm:$0xff] }
 0x134   : > { %v1428_v2 = vmul.f32 %v2999_v32, %v1414_v30  ;;  %v1320_v35 = vadd.f32 %v1312_v17, %v1288_v55  ;;  %v1344_v0 = vmul.f32 %v2938_v49, %v1328_v53  ;;  %v1376_v20 = vmul.f32 %v2963_v5, %v1360_v54  ;;  %v2037_v55 = vld [vmem:[%s3237_s9] ss:$0 sm:$0xff] }
 0x135   : > { %v1257_v56 = vadd.f32 %v1249_v46, %v1225_v43  ;;  %v1415_v4 = vadd.f32 %v1407_v37, %v1383_v18  ;;  %v1194_v24 = vadd.f32 %v1186_v1, %v1154_v60  ;;  %v1250_v45 = vmul.f32 %v2859_v26, %v1328_v53  ;;  %v2039_v60 = vld [vmem:[%s2613_s21 + $0x21] sm:$0xff]  ;;  %v2038_v18 = vld [vmem:[%s2613_s21 + $0x19] sm:$0xff] }
 0x136   : > { %v1442_v3 = vadd.f32 %v3018_v21, %v1428_v2  ;;  %v1352_v9 = vadd.f32 %v1344_v0, %v1320_v35  ;;  %v1313_v57 = vmul.f32 %v2893_v48, %v1391_v27  ;;  %v1345_v38 = vmul.f32 %v2938_v49, %v1329_v61 }
 0x137   : > { %v1289_v10 = vadd.f32 %v1281_v59, %v1257_v56  ;;  %v1429_v52 = vmul.f32 %v2999_v32, %v1415_v4  ;;  %v1226_v11 = vadd.f32 %v1218_v62, %v1194_v24  ;;  %v1282_v12 = vmul.f32 %v2882_v42, %v1360_v54  ;;  %v2043_v56 = vld [vmem:[%s2613_s21 + $0x39] sm:$0xff] }
 0x138   : > { %v1450_v41 = vmax.f32 %v1442_v3, 0.0  ;;  %v1384_v13 = vadd.f32 %v1376_v20, %v1352_v9  ;;  %v1408_v39 = vmul.f32 %v2972_v31, %v1392_v8  ;;  %v1377_v22 = vmul.f32 %v2963_v5, %v1361_v7 }
 0x139   : > { %v1321_v40 = vadd.f32 %v1313_v57, %v1289_v10  ;;  %v1443_v26 = vadd.f32 %v3018_v21, %v1429_v52  ;;  %v1258_v58 = vadd.f32 %v1250_v45, %v1226_v11  ;;  %v1314_v29 = vmul.f32 %v2893_v48, %v1392_v8  ;;  %v2042_v8 = vld [vmem:[%s2613_s21 + $0x31] sm:$0xff]  ;;  %v2048_v11 = vld [vmem:[%s2613_s21 + $0x49] sm:$0xff] }
 0x13a   : > { %2218 = vmatmul.mubr.msk.f32.vlgmr.msra.gmra.mrb[18].mxu1 %vm520_vm3, %v1450_v41  ;;  %v1416_v16 = vadd.f32 %v1408_v39, %v1384_v13  ;;  %v1409_v15 = vmul.f32 %v2972_v31, %v1393_v51  ;;  %v1346_v63 = vmul.f32 %v2938_v49, %v1330_v23  ;;  %v1378_v48 = vmul.f32 %v2963_v5, %v1362_v6  ;;  %v2049_v41 = vld [vmem:[%s2613_s21 + $0x51] sm:$0xff] }
 0x13b   : > { %2287 = vmatpush3.bf16.msra.mxu1 %v2689_v25  ;;  %v1353_v19 = vadd.f32 %v1345_v38, %v1321_v40  ;;  %v1451_v27 = vmax.f32 %v1443_v26, 0.0  ;;  %v1290_v42 = vadd.f32 %v1282_v12, %v1258_v58  ;;  %v1410_v37 = vmul.f32 %v2972_v31, %v1394_v36  ;;  %v2036_v31 = vld [vmem:[%s3236_s8] ss:$0 sm:$0xff]  ;;  %v2055_v58 = vld [vmem:[%s2613_s21 + $0x69] sm:$0xff] }
 0x13c   : > { %2289 = vmatprep.subr.bf16.mxu1 %v2701_v28  ;;  %v1430_v33 = vmul.f32 %v2999_v32, %v1416_v16 }
 0x13d   : > { %v1385_v34 = vadd.f32 %v1377_v22, %v1353_v19  ;;  %2228 = vmatprep.mubr.msk.f32.mxu0 %vm520_vm3, %v1451_v27  ;;  %v1322_v25 = vadd.f32 %v1314_v29, %v1290_v42  ;;  %v2054_v22 = vld [vmem:[%s2613_s21 + $0x61] sm:$0xff]  ;;  %s2369_s21 = scalar_lea.vmem %s3168_s19, 1024 }
 0x13e   : > { %v1444_v50 = vadd.f32 %v3018_v21, %v1430_v33  ;;  %p2370_p6 = scmp.ne.s32.totalorder %s3168_s19, %s2369_s21  ;;  %p2377_p11 = scmp.lt.s32.totalorder %s2375_s7, %s2369_s21 }
 0x13f   : > { %v1417_v44 = vadd.f32 %v1409_v15, %v1385_v34  ;;  %2291 = vmatpush3.bf16.msra.mxu1 %v2701_v28  ;;  %v1354_v14 = vadd.f32 %v1346_v63, %v1322_v25 }
 0x140   : > { %v1452_v46 = vmax.f32 %v1444_v50, 0.0  ;;  %p2371_p7 = pnand %p2370_p6, %p2577_p3  ;;  %p2378_p12 = por %p2377_p11, %p2376_p10 }
 0x141   : > { %v1431_v30 = vmul.f32 %v2999_v32, %v1417_v44  ;;  %v1386_v47 = vadd.f32 %v1378_v48, %v1354_v14 }
 0x142   : > { %2229 = vmatmul.mubr.msk.f32.vlgmr.msra.gmra.mrb[20].mxu0 %vm520_vm3, %v1452_v46  ;;  %p2372_p9 = pneg %p2371_p7 }
 0x143   : > { %v1445_v49 = vadd.f32 %v3018_v21, %v1431_v30  ;;  %v1418_v17 = vadd.f32 %v1410_v37, %v1386_v47 }
 0x144   : > { %p2379_p13 = pnand %p2378_p12, %p2372_p9 }
 0x145   : > { %v1453_v53 = vmax.f32 %v1445_v49, 0.0  ;;  %v1432_v28 = vmul.f32 %v2999_v32, %v1418_v17 }
 0x147   : > { %2239 = vmatprep.mubr.msk.f32.mxu1 %vm520_vm3, %v1453_v53  ;;  %v1446_v5 = vadd.f32 %v3018_v21, %v1432_v28 }
 0x149   : > { %v1454_v54 = vmax.f32 %v1446_v5, 0.0 }
 0x14b   : > { %2240 = vmatmul.mubr.msk.f32.vlgmr.msra.gmra.mrb[20].mxu1 %vm520_vm3, %v1454_v54 }
 0x1ff   : > { %v2208_v43 = vpop.f32.mrb[18].mxu0 }
 0x200   : > { %v1549_v32 = vmul.f32 %v2208_v43, %v2036_v31  ;;  %v1533_v59 = vpop.f32.mrb[19].mxu0 }
 0x201   : > { %v1548_v21 = vmul.f32 %v2036_v31, %v1533_v59 }
 0x202   : > { %v1557_v2 = vadd.f32 %v2037_v55, %v1549_v32 }
 0x203   : > { %v1556_v61 = vadd.f32 %v2037_v55, %v1548_v21 }
 0x204   : > { %v1561_v1 = vadd.f32 %v2039_v60, %v1557_v2 }
 0x205   : > { %v1560_v62 = vadd.f32 %v2038_v18, %v1556_v61 }
 0x206   : > { %1563 = vst.msk [vmem:[%s3140_s30 + $0x8] sm:$0xff] %vm396_vm1, %v1561_v1 }
 0x207   : > { %1562 = vst.msk [vmem:[%s3140_s30] sm:$0xff] %vm396_vm1, %v1560_v62 }
 0x20d   : > { %v2219_v35 = vpop.f32.mrb[18].mxu1 }
 0x20e   : > { %v1646_v0 = vmul.f32 %v2219_v35, %v2036_v31  ;;  %v1636_v20 = vpop.f32.mrb[19].mxu1 }
 0x20f   : > { %v1645_v3 = vmul.f32 %v2036_v31, %v1636_v20 }
 0x210   : > { %v1648_v4 = vadd.f32 %v2037_v55, %v1646_v0 }
 0x211   : > { %v1647_v24 = vadd.f32 %v2037_v55, %v1645_v3 }
 0x212   : > { %v1652_v45 = vadd.f32 %v2043_v56, %v1648_v4 }
 0x213   : > { %v1651_v9 = vadd.f32 %v2042_v8, %v1647_v24 }
 0x214   : > { %2045 = vst.msk [vmem:[%s3140_s30 + $0x18] sm:$0xff] %vm396_vm1, %v1652_v45 }
 0x215   : > { %2044 = vst.msk [vmem:[%s3140_s30 + $0x10] sm:$0xff] %vm396_vm1, %v1651_v9  ;;  %v2230_v10 = vpop.f32.mrb[20].mxu0 }
 0x216   : > { %v1738_v57 = vmul.f32 %v2230_v10, %v2036_v31  ;;  %v1728_v38 = vpop.f32.mrb[21].mxu0 }
 0x217   : > { %v1737_v52 = vmul.f32 %v2036_v31, %v1728_v38 }
 0x218   : > { %v1740_v7 = vadd.f32 %v2037_v55, %v1738_v57 }
 0x219   : > { %v1739_v12 = vadd.f32 %v2037_v55, %v1737_v52 }
 0x21a   : > { %v1744_v13 = vadd.f32 %v2049_v41, %v1740_v7 }
 0x21b   : > { %v1743_v39 = vadd.f32 %v2048_v11, %v1739_v12 }
 0x21c   : > { %2051 = vst.msk [vmem:[%s3140_s30 + $0x28] sm:$0xff] %vm396_vm1, %v1744_v13 }
 0x21d   : > { %2050 = vst.msk [vmem:[%s3140_s30 + $0x20] sm:$0xff] %vm396_vm1, %v1743_v39 }
 0x21e   : > { %v2241_v40 = vpop.f32.mrb[20].mxu1 }
 0x21f   : > { %v1830_v26 = vmul.f32 %v2241_v40, %v2036_v31  ;;  %v1820_v51 = vpop.f32.mrb[21].mxu1 }
 0x220   : > { %v1829_v16 = vmul.f32 %v2036_v31, %v1820_v51 }
 0x221   : > { %v1832_v19 = vadd.f32 %v2037_v55, %v1830_v26 }
 0x222   : > { %v1831_v23 = vadd.f32 %v2037_v55, %v1829_v16 }
 0x223   : > { %v1836_v27 = vadd.f32 %v2055_v58, %v1832_v19 }
 0x224   : > { %v1835_v42 = vadd.f32 %v2054_v22, %v1831_v23 }
 0x225   : > { %2057 = vst.msk [vmem:[%s3140_s30 + $0x38] sm:$0xff] %vm396_vm1, %v1836_v27 }
 0x226   : > { %2056 = vst.msk [vmem:[%s3140_s30 + $0x30] sm:$0xff] %vm396_vm1, %v1835_v42 }
 0x227   : > { %2382 = shalt.err (!%p2379_p13)
}
 0x228   : > { %s2383_s22 = scalar_lea.hbm %s3166_s24, 1024  ;;  %s2387_s0 = scalar_lea.hbm %s3238_s10, 8192 }
 0x229   : > { %p2384_p0 = scmp.ne.s32.totalorder %s3166_s24, %s2383_s22  ;;  %p2388_p4 = scmp.lt.u32.totalorder %s3166_s24, %s3238_s10 }
 0x22a   : > { %p2389_p5 = scmp.lt.u32.totalorder %s2387_s0, %s2383_s22  ;;  %p2391_p7 = scmp.lt.u32.totalorder %s2383_s22, %s3166_s24 }
 0x22b   : > { %p2385_p1 = pnand %p2384_p0, %p2577_p3 }
 0x22c   : > { %p2390_p6 = por %p2389_p5, %p2388_p4 }
 0x22d   : > { %p2386_p2 = pneg %p2385_p1 }
 0x22e   : > { %p2392_p9 = por %p2391_p7, %p2390_p6 }
 0x230   : > { %p2393_p10 = pnand %p2392_p9, %p2386_p2 }
 0x232   : > { %2396 = shalt.err (!%p2393_p10)
}
 0x233   : > { %s2469_s12 = smov 128   ;;  %s2470_s16 = smov 8  }
 0x234   : > { %2293 = dma.vmem_to_hbm [thread:$0]  (%p2577_p3), %s3168_s19, 1024, %s3166_s24, %s3176_s28, %s2469_s12, %s2469_s12, %s2470_s16  }
 0x235 PF: > { %p2299_p11 = scmp.ge.s32.totalorder %s2463_s20, 2  ;;  %s1872_s17 = sand.u32 1, %s2435_s13  }
 0x236   : > { %s1873_s21 = scalar_lea.sflag [#allocation4], %s1872_s17 }
 0x237   : > { %p2296_p12 = pnand %p2299_p11, %p2586_p8 }
 0x239   : > { %2430 = dma.done.wait (!%p2296_p12), %s1873_s21, 1024  }
 0x23a   : > { %2432 = vsyncadd (!%p2296_p12), %s1873_s21, 4294966272  ;;  %s23_s20 = sadd.s32 1, %s2463_s20   ;;  %s3263_s16 = sld [smem:[#allocation6_spill]] }
 0x23b   : > { %p20_p13 = scmp.ge.s32.totalorder %s23_s20, 10   ;;  %s3264_s17 = sld [smem:[#allocation7_spill]] }
 0x23c   : > { %s3265_s18 = sld [smem:[#allocation8_spill]]  ;;  %s3266_s19 = sld [smem:[#allocation9_spill]] }
 0x23d   : > { %s3267_s13 = smov %s2439_s14  ;;  %s3268_s14 = smov %s2443_s15 }
 0x23e   : > { %s3269_s15 = smov %s2595_s11  ;;  %22 = sbr.rel (!%p20_p13) target bundleno = 9 (0x9), region = 117 }
 0x245   :  { %1878 = vsyncpa [#allocation4], 1 }
 0x246   :  { %1880 = vsyncpa [#allocation4 + $0x1], 1 }

</bundles_post_ra>
